<compile_context>
chip_gen: v7x
topology: tpu7x:2x2x1
jax: 0.10.0
libtpu: 0.0.40
codegen_flags: <defaults>
</compile_context>

<pallas_src>
import functools

import jax
import jax.numpy as jnp
from jax.experimental import pallas as pl
from jax.experimental.pallas import tpu as pltpu

EPS = 1e-5
HALO = 16  # extra halo rows fetched per tile (only 2 are used; 16 keeps bf16 packing clean)


def _round_up(a, m):
    return (a + m - 1) // m * m


def _cdiv(a, b):
    return (a + b - 1) // b


# --------------------------------------------------------------------------- #
# pass 1: conv(3x3, pad=1) + bias + per-tile BN partial statistics
# --------------------------------------------------------------------------- #
def _conv_stats_kernel(xa_ref, xb_ref, w_ref, b_ref, y_ref, s_ref, ss_ref,
                       *, cin, th, w_img, h_img):
    wp2 = w_img + 2
    L = th * wp2

    xa = xa_ref[0]                                     # (Cin, TH,   W+2) bf16
    xb = xb_ref[0]                                     # (Cin, HALO, W+2) bf16
    # Flatten (rows, cols) onto the lane axis; halo rows appended contiguously.
    xflat = jnp.concatenate(
        [xa.reshape(cin, th * wp2), xb.reshape(cin, HALO * wp2)], axis=1)

    # In-VMEM im2col: 9 shifted lane-slices stacked on the contraction axis.
    taps = []
    for ky in range(3):
        for kx in range(3):
            s = ky * wp2 + kx
            taps.append(xflat[:, s:s + L])
    patches = jnp.concatenate(taps, axis=0)            # (9*Cin, TH*(W+2)) bf16

    # One folded MXU matmul (bf16 inputs, f32 accumulation) + bias.
    acc = jnp.dot(w_ref[...], patches,
                  preferred_element_type=jnp.float32)  # (Cout, TH*(W+2)) f32
    acc = acc + b_ref[...]                             # bias (Cout, 1)

    cout = acc.shape[0]
    acc3 = acc.reshape(cout, th, wp2)
    y_ref[0] = acc3.astype(y_ref.dtype)                # bf16 intermediate

    # BN partial statistics; mask the 2 halo junk columns and any padded rows.
    col = jax.lax.broadcasted_iota(jnp.int32, (th, wp2), 1)
    row = (jax.lax.broadcasted_iota(jnp.int32, (th, wp2), 0)
           + pl.program_id(1) * th)
    vf = jnp.logical_and(col < w_img, row < h_img).astype(jnp.float32)
    accv = acc3 * vf
    s_ref[0, 0] = accv.sum(axis=2).sum(axis=1).reshape(1, cout)
    ss_ref[0, 0] = (accv * accv).sum(axis=2).sum(axis=1).reshape(1, cout)


# --------------------------------------------------------------------------- #
# pass 2: y * scale + shift, ReLU, crop junk columns, write NCHW directly
# --------------------------------------------------------------------------- #
def _bn_relu_kernel(y_ref, scale_ref, shift_ref, o_ref, *, w_img):
    y = y_ref[0][:, :, :w_img].astype(jnp.float32)     # (Cout, TH, W)
    sc = scale_ref[...].reshape(-1, 1, 1)
    sh = shift_ref[...].reshape(-1, 1, 1)
    o_ref[0] = jnp.maximum(y * sc + sh, 0.0)


def conv_bn_relu(x_nchw, w_oihw, bias, gamma, beta):
    """Forward of Conv(in_channels, out_channels) for NCHW float32 input."""
    N, Cin, H, W = x_nchw.shape
    Cout = w_oihw.shape[0]
    Wp2 = W + 2

    # ---- per-generation sizing (v5e/v6e: 128 MiB VMEM, v7x: 64 MiB) --------
    try:
        cap = int(pltpu.get_tpu_info().vmem_capacity_bytes)
    except Exception:
        cap = 0
    if cap <= 0:
        cap = 64 * 1024 * 1024
    vmem_limit = max(16 * 1024 * 1024, min(cap // 2, 96 * 1024 * 1024))

    # Rough per-row VMEM footprint (double-buffered blocks + kernel temps).
    per_row = Wp2 * (26 * Cin + 16 * Cout) + 64
    th_cap = max(16, ((vmem_limit // 2) // per_row) // 16 * 16)
    TH = min(_round_up(H, 16), th_cap, 1024)
    nhb = _cdiv(H, TH)
    if N * nhb < 2 and TH > 16:        # keep both v7x TensorCores busy
        TH = max(16, _round_up(_cdiv(H, 2), 16))
        nhb = _cdiv(H, TH)
    Hp = nhb * TH
    Hpad_in = Hp + HALO                # 1 top pad + H rows + bottom pad/halo slack
    hb_step = TH // HALO if TH % HALO == 0 else None
    # TH is always a multiple of 16 == HALO here.
    hb_step = TH // HALO

    # ---- XLA-side prep: spatial pad + bf16 cast only (no im2col, no transpose)
    x_pad = jnp.pad(x_nchw.astype(jnp.float32),
                    ((0, 0), (0, 0), (1, Hpad_in - H - 1), (1, 1))
                    ).astype(jnp.bfloat16)             # (N, Cin, Hp+HALO, W+2)
    # weights folded tap-major: [co, (ky*3+kx)*Cin + ci] = w[co, ci, ky, kx]
    w2 = jnp.transpose(w_oihw, (0, 2, 3, 1)).reshape(Cout, 9 * Cin).astype(jnp.bfloat16)
    b2 = bias.reshape(Cout, 1).astype(jnp.float32)

    cparams = pltpu.CompilerParams(
        dimension_semantics=("parallel", "parallel"),
        vmem_limit_bytes=int(vmem_limit),
    )

    # ---- pass 1: conv + bias + per-tile BN partial statistics ---------------
    stats_cost = pl.CostEstimate(
        flops=2 * 9 * Cin * Cout * N * Hp * Wp2 + 6 * N * Hp * Wp2 * Cout,
        transcendentals=0,
        bytes_accessed=(N * Cin * (Hp + nhb * HALO) * Wp2 * 2
                        + 9 * Cin * Cout * 2 + Cout * 4
                        + N * Cout * Hp * Wp2 * 2
                        + 2 * N * nhb * Cout * 4),
    )
    y_pad, psum, psumsq = pl.pallas_call(
        functools.partial(_conv_stats_kernel, cin=Cin, th=TH, w_img=W, h_img=H),
        grid=(N, nhb),
        in_specs=[
            pl.BlockSpec((1, Cin, TH, Wp2), lambda n, h: (n, 0, h, 0)),
            pl.BlockSpec((1, Cin, HALO, Wp2),
                         lambda n, h, _s=hb_step: (n, 0, (h + 1) * _s, 0)),
            pl.BlockSpec((Cout, 9 * Cin), lambda n, h: (0, 0)),
            pl.BlockSpec((Cout, 1), lambda n, h: (0, 0)),
        ],
        out_specs=[
            pl.BlockSpec((1, Cout, TH, Wp2), lambda n, h: (n, 0, h, 0)),
            pl.BlockSpec((1, 1, 1, Cout), lambda n, h: (n, h, 0, 0)),
            pl.BlockSpec((1, 1, 1, Cout), lambda n, h: (n, h, 0, 0)),
        ],
        out_shape=[
            jax.ShapeDtypeStruct((N, Cout, Hp, Wp2), jnp.bfloat16),
            jax.ShapeDtypeStruct((N, nhb, 1, Cout), jnp.float32),
            jax.ShapeDtypeStruct((N, nhb, 1, Cout), jnp.float32),
        ],
        compiler_params=cparams,
        cost_estimate=stats_cost,
    )(x_pad, x_pad, w2, b2)

    # ---- tiny stats reduction + BN fold in plain JAX ------------------------
    cnt = float(N * H * W)
    s_tot = jnp.sum(psum, axis=(0, 1)).reshape(Cout)
    ss_tot = jnp.sum(psumsq, axis=(0, 1)).reshape(Cout)
    mean = s_tot / cnt
    var = jnp.maximum(ss_tot / cnt - mean * mean, 0.0)   # biased (training mode)
    inv = jax.lax.rsqrt(var + EPS)
    g = gamma.astype(jnp.float32)
    scale = (g * inv).reshape(Cout, 1)
    shift = (beta.astype(jnp.float32) - mean * g * inv).reshape(Cout, 1)

    # ---- pass 2: normalize + affine + ReLU, written directly in NCHW --------
    apply_cost = pl.CostEstimate(
        flops=3 * N * Cout * Hp * W,
        transcendentals=0,
        bytes_accessed=N * Cout * Hp * Wp2 * 2 + N * Cout * Hp * W * 4 + 2 * Cout * 4,
    )
    out_full = pl.pallas_call(
        functools.partial(_bn_relu_kernel, w_img=W),
        grid=(N, nhb),
        in_specs=[
            pl.BlockSpec((1, Cout, TH, Wp2), lambda n, h: (n, 0, h, 0)),
            pl.BlockSpec((Cout, 1), lambda n, h: (0, 0)),
            pl.BlockSpec((Cout, 1), lambda n, h: (0, 0)),
        ],
        out_specs=pl.BlockSpec((1, Cout, TH, W), lambda n, h: (n, 0, h, 0)),
        out_shape=jax.ShapeDtypeStruct((N, Cout, Hp, W), jnp.float32),
        compiler_params=cparams,
        cost_estimate=apply_cost,
    )(y_pad, scale, shift)

    if Hp != H:
        out_full = out_full[:, :, :H, :]
    return out_full


def _reference(x_nchw, w_oihw, bias, gamma, beta):
    """Pure-JAX reference (lax conv + training-mode BN + ReLU), f32 HIGHEST."""
    y = jax.lax.conv_general_dilated(
        x_nchw.astype(jnp.float32),
        w_oihw.astype(jnp.float32),
        window_strides=(1, 1),
        padding=((1, 1), (1, 1)),
        dimension_numbers=("NCHW", "OIHW", "NCHW"),
        precision=jax.lax.Precision.HIGHEST,
    ) + bias.reshape(1, -1, 1, 1)
    mean = jnp.mean(y, axis=(0, 2, 3), keepdims=True)
    var = jnp.mean((y - mean) ** 2, axis=(0, 2, 3), keepdims=True)
    y = (y - mean) * jax.lax.rsqrt(var + EPS)
    y = y * gamma.reshape(1, -1, 1, 1) + beta.reshape(1, -1, 1, 1)
    return jnp.maximum(y, 0.0)


if __name__ == "__main__":
    # small shapes consistent with Conv(in_channels=4, out_channels=8)
    N, Cin, Cout, H, W = 2, 4, 8, 16, 16

    key = jax.random.PRNGKey(0)
    kx, kw, kb = jax.random.split(key, 3)

    x = jax.random.normal(kx, (N, Cin, H, W), dtype=jnp.float32)

    # deterministic parameter init (PyTorch-style fan_in scaling for conv)
    fan_in = Cin * 3 * 3
    bound = 1.0 / (fan_in ** 0.5)
    w = jax.random.uniform(kw, (Cout, Cin, 3, 3), jnp.float32, -bound, bound)
    b = jax.random.uniform(kb, (Cout,), jnp.float32, -bound, bound)
    gamma = jnp.ones((Cout,), jnp.float32)   # BatchNorm2d default weight
    beta = jnp.zeros((Cout,), jnp.float32)   # BatchNorm2d default bias

    fwd = jax.jit(conv_bn_relu)
    out = jax.block_until_ready(fwd(x, w, b, gamma, beta))
    ref = jax.block_until_ready(_reference(x, w, b, gamma, beta))

    assert out.shape == (N, Cout, H, W), out.shape
    # bf16 MXU inputs -> slightly looser tolerance than pure-f32 (intentional)
    assert jnp.allclose(out, ref, atol=2e-2, rtol=2e-2), float(
        jnp.max(jnp.abs(out - ref))
    )

    print("KERNEL_OK")
</pallas_src>

<mosaic_0001>
module attributes {stable_mosaic.version = 11 : i64} {
  func.func @_conv_stats_kernel(%arg0: i32, %arg1: i32, %arg2: memref<1x4x16x18xbf16, #tpu.memory_space<vmem>>, %arg3: memref<1x4x16x18xbf16, #tpu.memory_space<vmem>>, %arg4: memref<8x36xbf16, #tpu.memory_space<vmem>>, %arg5: memref<8x1xf32, #tpu.memory_space<vmem>>, %arg6: memref<1x8x16x18xbf16, #tpu.memory_space<vmem>>, %arg7: memref<1x1x1x8xf32, #tpu.memory_space<vmem>>, %arg8: memref<1x1x1x8xf32, #tpu.memory_space<vmem>>) attributes {dimension_semantics = [#tpu.dimension_semantics<parallel>, #tpu.dimension_semantics<parallel>], iteration_bounds = array<i64: 2, 1>, scalar_prefetch = 0 : i64, scratch_operands = 0 : i64, tpu.core_type = #tpu.core_type<tc>, window_params = [{transform_indices = @transform_0, window_bounds = array<i64: 1, 4, 16, 18>}, {transform_indices = @transform_1, window_bounds = array<i64: 1, 4, 16, 18>}, {pipeline_mode = #tpu.pipeline_mode<synchronous>, transform_indices = @transform_2, window_bounds = array<i64: 8, 36>}, {pipeline_mode = #tpu.pipeline_mode<synchronous>, transform_indices = @transform_3, window_bounds = array<i64: 8, 1>}, {transform_indices = @transform_4, window_bounds = array<i64: 1, 8, 16, 18>}, {transform_indices = @transform_5, window_bounds = array<i64: 1, 1, 1, 8>}, {transform_indices = @transform_6, window_bounds = array<i64: 1, 1, 1, 8>}]} {
    %c0 = arith.constant 0 : index
    %c0_0 = arith.constant 0 : index
    %c0_1 = arith.constant 0 : index
    %c0_2 = arith.constant 0 : index
    %0 = vector.load %arg2[%c0, %c0_0, %c0_1, %c0_2] : memref<1x4x16x18xbf16, #tpu.memory_space<vmem>>, vector<1x4x16x18xbf16>
    %1 = vector.shape_cast %0 : vector<1x4x16x18xbf16> to vector<4x16x18xbf16>
    %c0_3 = arith.constant 0 : index
    %c0_4 = arith.constant 0 : index
    %c0_5 = arith.constant 0 : index
    %c0_6 = arith.constant 0 : index
    %2 = vector.load %arg3[%c0_3, %c0_4, %c0_5, %c0_6] : memref<1x4x16x18xbf16, #tpu.memory_space<vmem>>, vector<1x4x16x18xbf16>
    %3 = vector.shape_cast %2 : vector<1x4x16x18xbf16> to vector<4x16x18xbf16>
    %4 = vector.shape_cast %1 : vector<4x16x18xbf16> to vector<4x288xbf16>
    %5 = vector.shape_cast %3 : vector<4x16x18xbf16> to vector<4x288xbf16>
    %6 = tpu.concatenate %4, %5 in 1 : vector<4x288xbf16>, vector<4x288xbf16> -> vector<4x576xbf16>
    %7 = vector.extract_strided_slice %6 {offsets = [0, 0], sizes = [4, 288], strides = [1, 1]} : vector<4x576xbf16> to vector<4x288xbf16>
    %8 = vector.extract_strided_slice %6 {offsets = [0, 1], sizes = [4, 288], strides = [1, 1]} : vector<4x576xbf16> to vector<4x288xbf16>
    %9 = vector.extract_strided_slice %6 {offsets = [0, 2], sizes = [4, 288], strides = [1, 1]} : vector<4x576xbf16> to vector<4x288xbf16>
    %10 = vector.extract_strided_slice %6 {offsets = [0, 18], sizes = [4, 288], strides = [1, 1]} : vector<4x576xbf16> to vector<4x288xbf16>
    %11 = vector.extract_strided_slice %6 {offsets = [0, 19], sizes = [4, 288], strides = [1, 1]} : vector<4x576xbf16> to vector<4x288xbf16>
    %12 = vector.extract_strided_slice %6 {offsets = [0, 20], sizes = [4, 288], strides = [1, 1]} : vector<4x576xbf16> to vector<4x288xbf16>
    %13 = vector.extract_strided_slice %6 {offsets = [0, 36], sizes = [4, 288], strides = [1, 1]} : vector<4x576xbf16> to vector<4x288xbf16>
    %14 = vector.extract_strided_slice %6 {offsets = [0, 37], sizes = [4, 288], strides = [1, 1]} : vector<4x576xbf16> to vector<4x288xbf16>
    %15 = vector.extract_strided_slice %6 {offsets = [0, 38], sizes = [4, 288], strides = [1, 1]} : vector<4x576xbf16> to vector<4x288xbf16>
    %16 = tpu.concatenate %7, %8, %9, %10, %11, %12, %13, %14, %15 in 0 : vector<4x288xbf16>, vector<4x288xbf16>, vector<4x288xbf16>, vector<4x288xbf16>, vector<4x288xbf16>, vector<4x288xbf16>, vector<4x288xbf16>, vector<4x288xbf16>, vector<4x288xbf16> -> vector<36x288xbf16>
    %c0_7 = arith.constant 0 : index
    %c0_8 = arith.constant 0 : index
    %17 = vector.load %arg4[%c0_7, %c0_8] : memref<8x36xbf16, #tpu.memory_space<vmem>>, vector<8x36xbf16>
    %cst = arith.constant dense<0.000000e+00> : vector<8x288xf32>
    %18 = tpu.matmul %17, %16, %cst {dimension_numbers = #tpu.dot_dimension_numbers<[1], [0], [0], [1], [0, 0, 1, 1], [], []>} : vector<8x36xbf16>, vector<36x288xbf16>, vector<8x288xf32> -> vector<8x288xf32>
    %c0_9 = arith.constant 0 : index
    %c0_10 = arith.constant 0 : index
    %19 = vector.load %arg5[%c0_9, %c0_10] : memref<8x1xf32, #tpu.memory_space<vmem>>, vector<8x1xf32>
    %20 = vector.broadcast %19 : vector<8x1xf32> to vector<8x288xf32>
    %21 = arith.addf %18, %20 : vector<8x288xf32>
    %22 = vector.shape_cast %21 : vector<8x288xf32> to vector<8x16x18xf32>
    %23 = arith.truncf %22 : vector<8x16x18xf32> to vector<8x16x18xbf16>
    %c0_11 = arith.constant 0 : index
    %c0_12 = arith.constant 0 : index
    %c0_13 = arith.constant 0 : index
    %c0_14 = arith.constant 0 : index
    %24 = vector.load %arg6[%c0_11, %c0_12, %c0_13, %c0_14] : memref<1x8x16x18xbf16, #tpu.memory_space<vmem>>, vector<1x8x16x18xbf16>
    %25 = vector.shape_cast %24 : vector<1x8x16x18xbf16> to vector<8x16x18xbf16>
    %26 = vector.shape_cast %23 : vector<8x16x18xbf16> to vector<1x8x16x18xbf16>
    tpu.vector_store %arg6[%c0_11, %c0_12, %c0_13, %c0_14], %26 {strides = array<i32>} : memref<1x8x16x18xbf16, #tpu.memory_space<vmem>>, vector<1x8x16x18xbf16>,
    %27 = tpu.iota {dimensions = array<i32: 1>} : vector<16x18xi32>
    %28 = tpu.iota {dimensions = array<i32: 0>} : vector<16x18xi32>
    %c16_i32 = arith.constant 16 : i32
    %29 = arith.muli %arg1, %c16_i32 : i32
    %30 = vector.broadcast %29 : i32 to vector<16x18xi32>
    %31 = arith.addi %28, %30 : vector<16x18xi32>
    %c16_i32_15 = arith.constant 16 : i32
    %32 = vector.broadcast %c16_i32_15 : i32 to vector<16x18xi32>
    %33 = arith.cmpi slt, %27, %32 : vector<16x18xi32>
    %c16_i32_16 = arith.constant 16 : i32
    %34 = vector.broadcast %c16_i32_16 : i32 to vector<16x18xi32>
    %35 = arith.cmpi slt, %31, %34 : vector<16x18xi32>
    %36 = arith.andi %33, %35 : vector<16x18xi1>
    %37 = arith.extui %36 : vector<16x18xi1> to vector<16x18xi32>
    %38 = arith.sitofp %37 : vector<16x18xi32> to vector<16x18xf32>
    %39 = vector.shape_cast %38 : vector<16x18xf32> to vector<1x16x18xf32>
    %40 = vector.broadcast %39 : vector<1x16x18xf32> to vector<8x16x18xf32>
    %41 = arith.mulf %22, %40 : vector<8x16x18xf32>
    %cst_17 = arith.constant dense<0.000000e+00> : vector<8x16xf32>
    %42 = vector.multi_reduction <add>, %41, %cst_17 [2] : vector<8x16x18xf32> to vector<8x16xf32>
    %cst_18 = arith.constant dense<0.000000e+00> : vector<8xf32>
    %43 = vector.multi_reduction <add>, %42, %cst_18 [1] : vector<8x16xf32> to vector<8xf32>
    %44 = vector.shape_cast %43 : vector<8xf32> to vector<1x8xf32>
    %c0_19 = arith.constant 0 : index
    %c0_20 = arith.constant 0 : index
    %c0_21 = arith.constant 0 : index
    %c0_22 = arith.constant 0 : index
    %45 = vector.load %arg7[%c0_19, %c0_20, %c0_21, %c0_22] : memref<1x1x1x8xf32, #tpu.memory_space<vmem>>, vector<1x1x1x8xf32>
    %46 = vector.shape_cast %45 : vector<1x1x1x8xf32> to vector<1x8xf32>
    %47 = vector.shape_cast %44 : vector<1x8xf32> to vector<1x1x1x8xf32>
    tpu.vector_store %arg7[%c0_19, %c0_20, %c0_21, %c0_22], %47 {strides = array<i32>} : memref<1x1x1x8xf32, #tpu.memory_space<vmem>>, vector<1x1x1x8xf32>,
    %48 = arith.mulf %41, %41 : vector<8x16x18xf32>
    %cst_23 = arith.constant dense<0.000000e+00> : vector<8x16xf32>
    %49 = vector.multi_reduction <add>, %48, %cst_23 [2] : vector<8x16x18xf32> to vector<8x16xf32>
    %cst_24 = arith.constant dense<0.000000e+00> : vector<8xf32>
    %50 = vector.multi_reduction <add>, %49, %cst_24 [1] : vector<8x16xf32> to vector<8xf32>
    %51 = vector.shape_cast %50 : vector<8xf32> to vector<1x8xf32>
    %c0_25 = arith.constant 0 : index
    %c0_26 = arith.constant 0 : index
    %c0_27 = arith.constant 0 : index
    %c0_28 = arith.constant 0 : index
    %52 = vector.load %arg8[%c0_25, %c0_26, %c0_27, %c0_28] : memref<1x1x1x8xf32, #tpu.memory_space<vmem>>, vector<1x1x1x8xf32>
    %53 = vector.shape_cast %52 : vector<1x1x1x8xf32> to vector<1x8xf32>
    %54 = vector.shape_cast %51 : vector<1x8xf32> to vector<1x1x1x8xf32>
    tpu.vector_store %arg8[%c0_25, %c0_26, %c0_27, %c0_28], %54 {strides = array<i32>} : memref<1x1x1x8xf32, #tpu.memory_space<vmem>>, vector<1x1x1x8xf32>,
    return
  }
  func.func @transform_0(%arg0: i32, %arg1: i32) -> (i32, i32, i32, i32) {
    %c0_i32 = arith.constant 0 : i32
    %c0_i32_0 = arith.constant 0 : i32
    %c0_i32_1 = arith.constant 0 : i32
    return %arg0, %c0_i32, %arg1, %c0_i32_0 : i32, i32, i32, i32
  }
  func.func @transform_1(%arg0: i32, %arg1: i32) -> (i32, i32, i32, i32) {
    %c1_i32 = arith.constant 1 : i32
    %0 = arith.addi %arg1, %c1_i32 : i32
    %c1_i32_0 = arith.constant 1 : i32
    %1 = arith.muli %0, %c1_i32_0 : i32
    %c0_i32 = arith.constant 0 : i32
    %c0_i32_1 = arith.constant 0 : i32
    %c0_i32_2 = arith.constant 0 : i32
    return %arg0, %c0_i32, %1, %c0_i32_1 : i32, i32, i32, i32
  }
  func.func @transform_2(%arg0: i32, %arg1: i32) -> (i32, i32) {
    %c0_i32 = arith.constant 0 : i32
    %c0_i32_0 = arith.constant 0 : i32
    %c0_i32_1 = arith.constant 0 : i32
    return %c0_i32, %c0_i32_0 : i32, i32
  }
  func.func @transform_3(%arg0: i32, %arg1: i32) -> (i32, i32) {
    %c0_i32 = arith.constant 0 : i32
    %c0_i32_0 = arith.constant 0 : i32
    %c0_i32_1 = arith.constant 0 : i32
    return %c0_i32, %c0_i32_0 : i32, i32
  }
  func.func @transform_4(%arg0: i32, %arg1: i32) -> (i32, i32, i32, i32) {
    %c0_i32 = arith.constant 0 : i32
    %c0_i32_0 = arith.constant 0 : i32
    %c0_i32_1 = arith.constant 0 : i32
    return %arg0, %c0_i32, %arg1, %c0_i32_0 : i32, i32, i32, i32
  }
  func.func @transform_5(%arg0: i32, %arg1: i32) -> (i32, i32, i32, i32) {
    %c0_i32 = arith.constant 0 : i32
    %c0_i32_0 = arith.constant 0 : i32
    %c0_i32_1 = arith.constant 0 : i32
    return %arg0, %arg1, %c0_i32, %c0_i32_0 : i32, i32, i32, i32
  }
  func.func @transform_6(%arg0: i32, %arg1: i32) -> (i32, i32, i32, i32) {
    %c0_i32 = arith.constant 0 : i32
    %c0_i32_0 = arith.constant 0 : i32
    %c0_i32_1 = arith.constant 0 : i32
    return %arg0, %arg1, %c0_i32, %c0_i32_0 : i32, i32, i32, i32
  }
}

module attributes {stable_mosaic.version = 11 : i64} {
  func.func @_bn_relu_kernel(%arg0: i32, %arg1: i32, %arg2: memref<1x8x16x18xbf16, #tpu.memory_space<vmem>>, %arg3: memref<8x1xf32, #tpu.memory_space<vmem>>, %arg4: memref<8x1xf32, #tpu.memory_space<vmem>>, %arg5: memref<1x8x16x16xf32, #tpu.memory_space<vmem>>) attributes {dimension_semantics = [#tpu.dimension_semantics<parallel>, #tpu.dimension_semantics<parallel>], iteration_bounds = array<i64: 2, 1>, scalar_prefetch = 0 : i64, scratch_operands = 0 : i64, tpu.core_type = #tpu.core_type<tc>, window_params = [{transform_indices = @transform_0, window_bounds = array<i64: 1, 8, 16, 18>}, {pipeline_mode = #tpu.pipeline_mode<synchronous>, transform_indices = @transform_1, window_bounds = array<i64: 8, 1>}, {pipeline_mode = #tpu.pipeline_mode<synchronous>, transform_indices = @transform_2, window_bounds = array<i64: 8, 1>}, {transform_indices = @transform_3, window_bounds = array<i64: 1, 8, 16, 16>}]} {
    %c0 = arith.constant 0 : index
    %c0_0 = arith.constant 0 : index
    %c0_1 = arith.constant 0 : index
    %c0_2 = arith.constant 0 : index
    %0 = vector.load %arg2[%c0, %c0_0, %c0_1, %c0_2] : memref<1x8x16x18xbf16, #tpu.memory_space<vmem>>, vector<1x8x16x18xbf16>
    %1 = vector.shape_cast %0 : vector<1x8x16x18xbf16> to vector<8x16x18xbf16>
    %2 = vector.extract_strided_slice %1 {offsets = [0, 0, 0], sizes = [8, 16, 16], strides = [1, 1, 1]} : vector<8x16x18xbf16> to vector<8x16x16xbf16>
    %3 = arith.extf %2 : vector<8x16x16xbf16> to vector<8x16x16xf32>
    %c0_3 = arith.constant 0 : index
    %c0_4 = arith.constant 0 : index
    %4 = vector.load %arg3[%c0_3, %c0_4] : memref<8x1xf32, #tpu.memory_space<vmem>>, vector<8x1xf32>
    %5 = vector.shape_cast %4 : vector<8x1xf32> to vector<8x1x1xf32>
    %c0_5 = arith.constant 0 : index
    %c0_6 = arith.constant 0 : index
    %6 = vector.load %arg4[%c0_5, %c0_6] : memref<8x1xf32, #tpu.memory_space<vmem>>, vector<8x1xf32>
    %7 = vector.shape_cast %6 : vector<8x1xf32> to vector<8x1x1xf32>
    %8 = vector.broadcast %5 : vector<8x1x1xf32> to vector<8x16x16xf32>
    %9 = arith.mulf %3, %8 : vector<8x16x16xf32>
    %10 = vector.broadcast %7 : vector<8x1x1xf32> to vector<8x16x16xf32>
    %11 = arith.addf %9, %10 : vector<8x16x16xf32>
    %cst = arith.constant 0.000000e+00 : f32
    %12 = vector.broadcast %cst : f32 to vector<8x16x16xf32>
    %13 = arith.maximumf %11, %12 : vector<8x16x16xf32>
    %c0_7 = arith.constant 0 : index
    %c0_8 = arith.constant 0 : index
    %c0_9 = arith.constant 0 : index
    %c0_10 = arith.constant 0 : index
    %14 = vector.load %arg5[%c0_7, %c0_8, %c0_9, %c0_10] : memref<1x8x16x16xf32, #tpu.memory_space<vmem>>, vector<1x8x16x16xf32>
    %15 = vector.shape_cast %14 : vector<1x8x16x16xf32> to vector<8x16x16xf32>
    %16 = vector.shape_cast %13 : vector<8x16x16xf32> to vector<1x8x16x16xf32>
    tpu.vector_store %arg5[%c0_7, %c0_8, %c0_9, %c0_10], %16 {strides = array<i32>} : memref<1x8x16x16xf32, #tpu.memory_space<vmem>>, vector<1x8x16x16xf32>,
    return
  }
  func.func @transform_0(%arg0: i32, %arg1: i32) -> (i32, i32, i32, i32) {
    %c0_i32 = arith.constant 0 : i32
    %c0_i32_0 = arith.constant 0 : i32
    %c0_i32_1 = arith.constant 0 : i32
    return %arg0, %c0_i32, %arg1, %c0_i32_0 : i32, i32, i32, i32
  }
  func.func @transform_1(%arg0: i32, %arg1: i32) -> (i32, i32) {
    %c0_i32 = arith.constant 0 : i32
    %c0_i32_0 = arith.constant 0 : i32
    %c0_i32_1 = arith.constant 0 : i32
    return %c0_i32, %c0_i32_0 : i32, i32
  }
  func.func @transform_2(%arg0: i32, %arg1: i32) -> (i32, i32) {
    %c0_i32 = arith.constant 0 : i32
    %c0_i32_0 = arith.constant 0 : i32
    %c0_i32_1 = arith.constant 0 : i32
    return %c0_i32, %c0_i32_0 : i32, i32
  }
  func.func @transform_3(%arg0: i32, %arg1: i32) -> (i32, i32, i32, i32) {
    %c0_i32 = arith.constant 0 : i32
    %c0_i32_0 = arith.constant 0 : i32
    %c0_i32_1 = arith.constant 0 : i32
    return %arg0, %c0_i32, %arg1, %c0_i32_0 : i32, i32, i32, i32
  }
}

</mosaic_0001>

<bundles_post_ra>
// kernel: conv_bn_relu.3
= control target key start
LH: loop header
LB: loop body
LE: loop exit
PB: predicated region body
PF: predicated region fallthrough
CT: control target
= control target key end

     0   :  { %8 = vsyncpa [#allocation3], 0  ;;  %s1014_s0 = inlined_call_operand.vmem [shape: bf16[2,8,16,18], index: 0, kind: input, shape index: {}]   ;;  %s1015_s1 = inlined_call_operand.vmem [shape: f32[8,1], index: 1, kind: input, shape index: {}]   ;;  %s1016_s2 = inlined_call_operand.vmem [shape: f32[8,1], index: 2, kind: input, shape index: {}]   ;;  %s1017_s3 = inlined_call_operand.hbm [shape: f32[2,8,16,16], index: 3, kind: output, shape index: {}]  }
   0x1   :  { %10 = vsyncpa [#allocation3 + $0x1], 0  ;;  %s844_s12 = smov 0   ;;  %s846_s13 = smov 0  }
   0x2   :  { %s848_s14 = smov 0   ;;  %s850_s15 = smov 0  }
   0x3   :  { %s852_s16 = smov 0   ;;  %s854_s17 = smov 0  }
   0x4 LB: > { %s622_s18 = sadd.s32 4294967295, %s817_s17   ;;  %s623_s19 = sadd.s32 4294967294, %s817_s17   ;;  %s817_s17 = sphi %s854_s17, %s16_s17   ;;  %s813_s16 = sphi %s852_s16, %s1024_s16   ;;  %s809_s15 = sphi %s850_s15, %s1023_s15   ;;  %s805_s14 = sphi %s848_s14, %s1022_s14   ;;  %s801_s13 = sphi %s846_s13, %s1021_s13   ;;  %s797_s12 = sphi %s844_s12, %s1020_s12  }
   0x5   : > { %s28_s20 = sadd.s32 1, %s813_s16  ;;  %s107_s21 = sadd.s32 1, %s805_s14 }
   0x6   : > { %p30_p0 = scmp.ge.s32.totalorder %s28_s20, 2  ;;  %p117_p1 = scmp.ne.s32.totalorder %s805_s14, %s801_s13 }
   0x7   : > { %p118_p2 = scmp.eq.s32.totalorder %s622_s18, 1  ;;  %p123_p3 = scmp.ne.s32.totalorder %s801_s13, %s797_s12 }
   0x8   : > { %s1026_s20 = smov (%p30_p0, %s28_s20), 0  ;;  %p124_p5 = scmp.eq.s32.totalorder %s623_s19, 1 }
   0x9   : > { %p884_p4 = por %p118_p2, %p117_p1  ;;  %s102_s23 = ssub.s32 %s813_s16, %s1026_s20 }
   0xa   : > { %p626_p6 = scmp.ge.s32.totalorder %s817_s17, 1  ;;  %p105_p7 = scmp.eq.s32.totalorder %s102_s23, 0 }
   0xb   : > { %p891_p8 = por %p124_p5, %p123_p3  ;;  %p161_p9 = scmp.lt.s32.totalorder %s817_s17, 3 }
   0xc   : > { %s897_s25 = scalar_select %p105_p7, %s805_s14, %s107_s21  }
   0xd   : > { %p162_p10 = pnand %p626_p6, %p161_p9 }
   0xe   : > { %v238_v0 = vlaneseq (!%p162_p10)  ;;  %v819_v1 = vmov (!%p162_p10), 0   ;;  %v820_v2 = vmov (!%p162_p10), 1966171168   ;;  %v232_v4 = vld [vmem:[%s1015_s1] sm:$0xff] (!%p162_p10)  ;;  %p190_p11 = scmp.lt.s32.totalorder (!%p162_p10), %s809_s15, 1  ;;  %s186_s8 = sand.u32 (!%p162_p10), 1, %s801_s13  }
   0xf   : > { %165 = sbr.rel (%p162_p10) target bundleno = 204 (0xcc), region = 32  ;;  %735 = vset.pattern.permute.xlu0 (!%p162_p10), %v819_v1  ;;  %v236_v3 = vunpack.c.l.s4 (!%p162_p10), %v820_v2  ;;  %736 = vset.pattern.permute.xlu1 (!%p162_p10), %v819_v1  ;;  %v234_v7 = vcombine.high (!%p162_p10), %v232_v4, %v232_v4  ;;  %v283_v8 = vld [vmem:[%s1016_s2] sm:$0xff] (!%p162_p10)  ;;  %s627_s9 = sshll.u32 (!%p162_p10), %s186_s8, 7  ;;  %vm510_vm0 = vcmask (!%p162_p10), 130048  }
  0x10   : > { %v239_v5 = vshrl.u32 (!%p162_p10), %v238_v0, 7  ;;  %v285_v31 = vcombine.high (!%p162_p10), %v283_v8, %v283_v8  ;;  %s920_s10 = scalar_lea.vmem (!%p162_p10), [#allocation2], %s627_s9  ;;  %s636_s11 = sshll.u32 (!%p162_p10), %s809_s15, 11 }
  0x11   : > { %v237_v6 = vunpack.c.0.s8 (!%p162_p10), %v236_v3  ;;  %s543_s18 = sshll.u32 (!%p162_p10), %s920_s10, 4  ;;  %s954_s23 = scalar_lea.hbm (!%p162_p10), %s1017_s3, %s636_s11  ;;  %s956_s18 = int_to_ptr.vmem [resolvable:$true] %s543_s18 }
  0x12   : > { %v336_v11 = vsub.s32 (!%p162_p10), 0, %v239_v5  ;;  %s739_s26 = scalar_lea.vmem (!%p162_p10), %s956_s18, 2048  ;;  %s821_s27 = smov (!%p162_p10), [#allocation2]  }
  0x13   : > { %v240_v9 = vsub.s32 (!%p162_p10), %v237_v6, %v239_v5  ;;  %p740_p12 = scmp.ne.s32.totalorder (!%p162_p10), %s956_s18, %s739_s26  ;;  %s743_s28 = sshll.u32 (!%p162_p10), %s821_s27, 4  ;;  %s744_s28 = int_to_ptr.vmem [resolvable:$false] %s743_s28 }
  0x14   : > { %s745_s29 = scalar_lea.vmem (!%p162_p10), %s744_s28, 4096  ;;  %p746_p1 = scmp.lt.s32.totalorder (!%p162_p10), %s956_s18, %s744_s28 }
  0x15   : > { %v241_v10 = vrot.slane (!%p162_p10), %v232_v4, %v240_v9  ;;  %v248_v12 = vrot.slane (!%p162_p10), %v234_v7, %v240_v9  ;;  %v292_v13 = vrot.slane (!%p162_p10), %v283_v8, %v240_v9  ;;  %v299_v36 = vrot.slane (!%p162_p10), %v285_v31, %v240_v9  ;;  %p741_p13 = pnand (!%p162_p10), %p740_p12, %p884_p4  ;;  %p747_p2 = scmp.lt.s32.totalorder (!%p162_p10), %s745_s29, %s739_s26 }
  0x16   : > { %s191_s30 = scalar_select %p190_p11, %s809_s15, 1 }
  0x17   : > { %v257_v14 = vrot.slane %v241_v10, %v240_v9  ;;  %v249_v15 = vcombine.high %v241_v10, %v241_v10  ;;  %v264_v16 = vrot.slane %v248_v12, %v240_v9  ;;  %v250_v17 = vcombine.high %v248_v12, %v248_v12  ;;  %s968_s15 = scalar_lea.sflag [#allocation3], %s186_s8  ;;  %p742_p0 = pneg %p741_p13 }
  0x18   : > { %v300_v21 = vcombine.high %v292_v13, %v292_v13  ;;  %v308_v33 = vrot.slane %v292_v13, %v240_v9  ;;  %v301_v41 = vcombine.high %v299_v36, %v299_v36  ;;  %v315_v43 = vrot.slane %v299_v36, %v240_v9  ;;  %s635_s4 = sshll.u32 %s191_s30, 6  ;;  %p748_p3 = por %p747_p2, %p746_p1 }
  0x19   : > { %v337_v18 = vrot.slane %v257_v14, %v336_v11  ;;  %v279_v19 = vcombine.high %v257_v14, %v257_v14  ;;  %v278_v20 = vrot.slane %v250_v17, %v240_v9  ;;  %v353_v23 = vrot.slane %v264_v16, %v336_v11  ;;  %s910_s7 = scalar_lea.vmem %s1014_s0, %s635_s4 }
  0x1a   : > { %v271_v24 = vrot.slane %v249_v15, %v240_v9  ;;  %v322_v26 = vrot.slane %v300_v21, %v240_v9  ;;  %v280_v28 = vcombine.high %v264_v16, %v264_v16  ;;  %v417_v37 = vrot.slane %v308_v33, %v336_v11  ;;  %v669_v54 = vld [vmem:[%s910_s7 + $0x8] sm:$0xff]   ;;  %v638_v59 = vld [vmem:[%s910_s7] sm:$0xff]   ;;  %v670_v4 = vld [vmem:[%s910_s7 + $0x10] sm:$0xff]   ;;  %p749_p5 = pnand %p748_p3, %p742_p0 }
  0x1b   : > { %367 = vperm.xlu0 %735, %v337_v18   ;;  %v345_v22 = vrot.slane %v279_v19, %v336_v11  ;;  %v357_v25 = vrot.slane %v278_v20, %v336_v11  ;;  %v282_v35 = vcombine.high %v278_v20, %v278_v20  ;;  %v330_v38 = vcombine.high %v308_v33, %v308_v33  ;;  %v672_v14 = vld [vmem:[%s910_s7 + $0x20] sm:$0xff]   ;;  %v673_v16 = vld [vmem:[%s910_s7 + $0x28] sm:$0xff]  }
  0x1c   : > { %v341_v27 = vrot.slane %v271_v24, %v336_v11  ;;  %v421_v29 = vrot.slane %v322_v26, %v336_v11  ;;  %v281_v30 = vcombine.high %v271_v24, %v271_v24  ;;  %v361_v32 = vrot.slane %v280_v28, %v336_v11 }
  0x1d   : > { %375 = vperm.xlu1 %736, %v345_v22   ;;  %v365_v39 = vrot.slane %v282_v35, %v336_v11  ;;  %v332_v40 = vcombine.high %v322_v26, %v322_v26  ;;  %v425_v42 = vrot.slane %v330_v38, %v336_v11  ;;  %v329_v45 = vrot.slane %v301_v41, %v240_v9  ;;  %v671_v9 = vld [vmem:[%s910_s7 + $0x18] sm:$0xff]   ;;  %v674_v26 = vld [vmem:[%s910_s7 + $0x30] sm:$0xff]  }
  0x1e   : > { %v349_v34 = vrot.slane %v281_v30, %v336_v11  ;;  %v433_v46 = vrot.slane %v315_v43, %v336_v11  ;;  %v331_v47 = vcombine.high %v315_v43, %v315_v43  ;;  %v643_v56 = vunpack.c.l.bf16 %v669_v54 }
  0x1f   : > { %383 = vperm.xlu0 %735, %v353_v23   ;;  %v429_v44 = vrot.slane %v332_v40, %v336_v11  ;;  %v437_v48 = vrot.slane %v329_v45, %v336_v11  ;;  %v333_v49 = vcombine.high %v329_v45, %v329_v45  ;;  %v644_v57 = vunpack.c.h.bf16 %v669_v54 }
  0x20   : > { %v441_v50 = vrot.slane %v331_v47, %v336_v11  ;;  %v639_v0 = vunpack.c.l.bf16 %v638_v59  ;;  %v640_v1 = vunpack.c.h.bf16 %v638_v59  ;;  %v647_v12 = vunpack.c.l.bf16 %v670_v4 }
  0x21   : > { %387 = vperm.xlu1 %736, %v357_v25   ;;  %v445_v51 = vrot.slane %v333_v49, %v336_v11  ;;  %v648_v13 = vunpack.c.h.bf16 %v670_v4  ;;  %v651_v17 = vunpack.c.l.bf16 %v671_v9  ;;  %v652_v18 = vunpack.c.h.bf16 %v671_v9 }
  0x22   : > { %v655_v21 = vunpack.c.l.bf16 %v672_v14  ;;  %v656_v22 = vunpack.c.h.bf16 %v672_v14  ;;  %v660_v30 = vunpack.c.h.bf16 %v673_v16  ;;  %v664_v40 = vunpack.c.h.bf16 %v674_v26 }
  0x23   : > { %371 = vperm.xlu0 %735, %v341_v27  }
  0x25   : > { %451 = vperm.xlu1 %736, %v421_v29   ;;  %v659_v29 = vunpack.c.l.bf16 %v673_v16 }
  0x27   : > { %391 = vperm.xlu0 %735, %v361_v32  }
  0x29   : > { %379 = vperm.xlu1 %736, %v349_v34   ;;  %v675_v34 = vld [vmem:[%s910_s7 + $0x38] sm:$0xff]  }
  0x2a   : > { %v668_v49 = vunpack.c.h.bf16 %v675_v34 }
  0x2b   : > { %447 = vperm.xlu0 %735, %v417_v37  }
  0x2d   : > { %395 = vperm.xlu1 %736, %v365_v39   ;;  %v663_v39 = vunpack.c.l.bf16 %v674_v26 }
  0x2f   : > { %455 = vperm.xlu0 %735, %v425_v42  }
  0x31   : > { %459 = vperm.xlu1 %736, %v429_v44  }
  0x33   : > { %463 = vperm.xlu0 %735, %v433_v46  }
  0x35   : > { %467 = vperm.xlu1 %736, %v437_v48   ;;  %v667_v48 = vunpack.c.l.bf16 %v675_v34 }
  0x37   : > { %471 = vperm.xlu0 %735, %v441_v50  }
  0x39   : > { %475 = vperm.xlu1 %736, %v445_v51  }
  0x9a   : > { %v368_v52 = vpop.permute.xlu0 %367 }
  0x9b   : > { %v398_v10 = vmul.f32 %v639_v0, %v368_v52  ;;  %v399_v11 = vmul.f32 %v640_v1, %v368_v52 }
  0x9c   : > { %v376_v53 = vpop.permute.xlu1 %375 }
  0x9d   : > { %v402_v24 = vmul.f32 %v647_v12, %v376_v53  ;;  %v403_v25 = vmul.f32 %v648_v13, %v376_v53 }
  0x9e   : > { %v384_v55 = vpop.permute.xlu0 %383 }
  0x9f   : > { %v406_v37 = vmul.f32 %v655_v21, %v384_v55  ;;  %v407_v38 = vmul.f32 %v656_v22, %v384_v55 }
  0xa0   : > { %v388_v58 = vpop.permute.xlu1 %387 }
  0xa1   : > { %v408_v46 = vmul.f32 %v659_v29, %v388_v58  ;;  %v409_v47 = vmul.f32 %v660_v30, %v388_v58 }
  0xa2   : > { %v372_v60 = vpop.permute.xlu0 %371 }
  0xa3   : > { %v400_v61 = vmul.f32 %v643_v56, %v372_v60  ;;  %v401_v62 = vmul.f32 %v644_v57, %v372_v60 }
  0xa4   : > { %v452_v63 = vpop.permute.xlu1 %451 }
  0xa5   : > { %v480_v2 = vadd.f32 %v452_v63, %v400_v61  ;;  %v481_v3 = vadd.f32 %v452_v63, %v401_v62 }
  0xa6   : > { %v392_v5 = vpop.permute.xlu0 %391 }
  0xa7   : > { %v496_v6 = vmax.f32 %v480_v2, 0.0  ;;  %v497_v7 = vmax.f32 %v481_v3, 0.0  ;;  %v410_v55 = vmul.f32 %v663_v39, %v392_v5  ;;  %v411_v56 = vmul.f32 %v664_v40, %v392_v5 }
  0xa8   : > { %v380_v8 = vpop.permute.xlu1 %379 }
  0xa9   : > { %513 = vst.msk [vmem:[%s920_s10 + $0x10] sm:$0xff] %vm510_vm0, %v496_v6  ;;  %514 = vst.msk [vmem:[%s920_s10 + $0x18] sm:$0xff] %vm510_vm0, %v497_v7  ;;  %v404_v32 = vmul.f32 %v651_v17, %v380_v8  ;;  %v405_v33 = vmul.f32 %v652_v18, %v380_v8 }
  0xaa   : > { %v448_v15 = vpop.permute.xlu0 %447 }
  0xab   : > { %v478_v19 = vadd.f32 %v448_v15, %v398_v10  ;;  %v479_v20 = vadd.f32 %v448_v15, %v399_v11 }
  0xac   : > { %v396_v23 = vpop.permute.xlu1 %395 }
  0xad   : > { %v494_v27 = vmax.f32 %v478_v19, 0.0  ;;  %v495_v28 = vmax.f32 %v479_v20, 0.0  ;;  %v412_v62 = vmul.f32 %v667_v48, %v396_v23  ;;  %v413_v63 = vmul.f32 %v668_v49, %v396_v23 }
  0xae   : > { %v456_v31 = vpop.permute.xlu0 %455 }
  0xaf   : > { %511 = vst.msk [vmem:[%s920_s10] sm:$0xff] %vm510_vm0, %v494_v27  ;;  %512 = vst.msk [vmem:[%s920_s10 + $0x8] sm:$0xff] %vm510_vm0, %v495_v28  ;;  %v482_v35 = vadd.f32 %v456_v31, %v402_v24  ;;  %v483_v36 = vadd.f32 %v456_v31, %v403_v25 }
  0xb0   : > { %v460_v41 = vpop.permute.xlu1 %459 }
  0xb1   : > { %v498_v42 = vmax.f32 %v482_v35, 0.0  ;;  %v499_v43 = vmax.f32 %v483_v36, 0.0  ;;  %v484_v44 = vadd.f32 %v460_v41, %v404_v32  ;;  %v485_v45 = vadd.f32 %v460_v41, %v405_v33 }
  0xb2   : > { %v464_v50 = vpop.permute.xlu0 %463 }
  0xb3   : > { %515 = vst.msk [vmem:[%s920_s10 + $0x20] sm:$0xff] %vm510_vm0, %v498_v42  ;;  %516 = vst.msk [vmem:[%s920_s10 + $0x28] sm:$0xff] %vm510_vm0, %v499_v43  ;;  %v500_v51 = vmax.f32 %v484_v44, 0.0  ;;  %v501_v52 = vmax.f32 %v485_v45, 0.0  ;;  %v486_v53 = vadd.f32 %v464_v50, %v406_v37  ;;  %v487_v54 = vadd.f32 %v464_v50, %v407_v38 }
  0xb4   : > { %v468_v57 = vpop.permute.xlu1 %467 }
  0xb5   : > { %517 = vst.msk [vmem:[%s920_s10 + $0x30] sm:$0xff] %vm510_vm0, %v500_v51  ;;  %518 = vst.msk [vmem:[%s920_s10 + $0x38] sm:$0xff] %vm510_vm0, %v501_v52  ;;  %v502_v58 = vmax.f32 %v486_v53, 0.0  ;;  %v503_v59 = vmax.f32 %v487_v54, 0.0  ;;  %v488_v60 = vadd.f32 %v468_v57, %v408_v46  ;;  %v489_v61 = vadd.f32 %v468_v57, %v409_v47 }
  0xb6   : > { %v472_v0 = vpop.permute.xlu0 %471 }
  0xb7   : > { %519 = vst.msk [vmem:[%s920_s10 + $0x40] sm:$0xff] %vm510_vm0, %v502_v58  ;;  %520 = vst.msk [vmem:[%s920_s10 + $0x48] sm:$0xff] %vm510_vm0, %v503_v59  ;;  %v504_v1 = vmax.f32 %v488_v60, 0.0  ;;  %v505_v2 = vmax.f32 %v489_v61, 0.0  ;;  %v490_v3 = vadd.f32 %v472_v0, %v410_v55  ;;  %v491_v4 = vadd.f32 %v472_v0, %v411_v56 }
  0xb8   : > { %v476_v5 = vpop.permute.xlu1 %475 }
  0xb9   : > { %521 = vst.msk [vmem:[%s920_s10 + $0x50] sm:$0xff] %vm510_vm0, %v504_v1  ;;  %522 = vst.msk [vmem:[%s920_s10 + $0x58] sm:$0xff] %vm510_vm0, %v505_v2  ;;  %v506_v6 = vmax.f32 %v490_v3, 0.0  ;;  %v507_v7 = vmax.f32 %v491_v4, 0.0  ;;  %v492_v8 = vadd.f32 %v476_v5, %v412_v62  ;;  %v493_v9 = vadd.f32 %v476_v5, %v413_v63 }
  0xbb   : > { %523 = vst.msk [vmem:[%s920_s10 + $0x60] sm:$0xff] %vm510_vm0, %v506_v6  ;;  %524 = vst.msk [vmem:[%s920_s10 + $0x68] sm:$0xff] %vm510_vm0, %v507_v7  ;;  %v508_v10 = vmax.f32 %v492_v8, 0.0  ;;  %v509_v11 = vmax.f32 %v493_v9, 0.0 }
  0xbd   : > { %525 = vst.msk [vmem:[%s920_s10 + $0x70] sm:$0xff] %vm510_vm0, %v508_v10  ;;  %526 = vst.msk [vmem:[%s920_s10 + $0x78] sm:$0xff] %vm510_vm0, %v509_v11 }
  0xbe   : > { %752 = shalt.err (!%p749_p5)
}
  0xbf   : > { %s753_s30 = scalar_lea.hbm %s954_s23, 2048  ;;  %s757_s6 = scalar_lea.hbm %s1017_s3, 4096 }
  0xc0   : > { %p754_p6 = scmp.ne.s32.totalorder %s954_s23, %s753_s30  ;;  %p758_p10 = scmp.lt.u32.totalorder %s954_s23, %s1017_s3 }
  0xc1   : > { %p759_p11 = scmp.lt.u32.totalorder %s757_s6, %s753_s30  ;;  %p761_p13 = scmp.lt.u32.totalorder %s753_s30, %s954_s23 }
  0xc2   : > { %p755_p7 = pnand %p754_p6, %p884_p4 }
  0xc3   : > { %p760_p12 = por %p759_p11, %p758_p10 }
  0xc4   : > { %p756_p9 = pneg %p755_p7 }
  0xc5   : > { %p762_p0 = por %p761_p13, %p760_p12 }
  0xc7   : > { %p763_p1 = pnand %p762_p0, %p756_p9 }
  0xc9   : > { %766 = shalt.err (!%p763_p1)
}
  0xca   : > { %s822_s9 = smov 128   ;;  %s823_s10 = smov 8  }
  0xcb   : > { %676 = dma.vmem_to_hbm [thread:$0]  (%p884_p4), %s956_s18, 2048, %s954_s23, %s968_s15, %s822_s9, %s822_s9, %s823_s10  }
  0xcc PF: > { %p682_p2 = scmp.ge.s32.totalorder %s817_s17, 2  ;;  %s558_s11 = sand.u32 1, %s797_s12  }
  0xcd   : > { %s559_s19 = scalar_lea.sflag [#allocation3], %s558_s11 }
  0xce   : > { %p679_p3 = pnand %p682_p2, %p891_p8 }
  0xd0   : > { %792 = dma.done.wait (!%p679_p3), %s559_s19, 2048  }
  0xd1   : > { %794 = vsyncadd (!%p679_p3), %s559_s19, 4294965248  ;;  %s16_s17 = sadd.s32 1, %s817_s17   ;;  %s1020_s12 = smov %s801_s13 }
  0xd2   : > { %p13_p5 = scmp.ge.s32.totalorder %s16_s17, 4   ;;  %s1021_s13 = smov %s805_s14 }
  0xd3   : > { %s1022_s14 = smov %s897_s25  ;;  %s1023_s15 = smov %s813_s16 }
  0xd4   : > { %s1024_s16 = smov %s1026_s20  ;;  %15 = sbr.rel (!%p13_p5) target bundleno = 4 (0x4), region = 67 }
  0xdb   :  { %564 = vsyncpa [#allocation3], 1 }
  0xdc   :  { %566 = vsyncpa [#allocation3 + $0x1], 1 }

// kernel: conv_bn_relu.2
= control target key start
LH: loop header
LB: loop body
LE: loop exit
PB: predicated region body
PF: predicated region fallthrough
CT: control target
= control target key end

     0   :  { %s2411_s21 = smov 0   ;;  %s2413_s22 = smov 0   ;;  %s2909_s0 = inlined_call_operand.vmem [shape: bf16[2,4,32,18], index: 0, kind: input, shape index: {}, may-alias: {0,1}]   ;;  %s2910_s1 = inlined_call_operand.vmem [shape: bf16[2,4,32,18], index: 1, kind: input, shape index: {}, may-alias: {0,1}]   ;;  %s2911_s2 = inlined_call_operand.vmem [shape: bf16[8,36], index: 2, kind: input, shape index: {}]   ;;  %s2912_s3 = inlined_call_operand.vmem [shape: f32[8,1], index: 3, kind: input, shape index: {}]   ;;  %s2913_s4 = inlined_call_operand.vmem [shape: bf16[2,8,16,18], index: 4, kind: output, shape index: {0}]   ;;  %s2914_s5 = inlined_call_operand.vmem [shape: f32[2,1,1,8], index: 5, kind: output, shape index: {1}]   ;;  %s2915_s6 = inlined_call_operand.vmem [shape: f32[2,1,1,8], index: 6, kind: output, shape index: {2}]  }
   0x1   :  { %s2415_s23 = smov 0   ;;  %s2417_s24 = smov 0  }
   0x2   :  { %s2419_s25 = smov 0  }
   0x3 LB: > { %s29_s26 = sadd.s32 1, %s2331_s24  ;;  %p45_p1 = scmp.ne.s32.totalorder %s2323_s22, %s2319_s21  ;;  %s2335_s25 = sphi %s2419_s25, %s17_s25   ;;  %s2331_s24 = sphi %s2417_s24, %s2920_s24   ;;  %s2327_s23 = sphi %s2415_s23, %s2919_s23   ;;  %s2323_s22 = sphi %s2413_s22, %s2918_s22   ;;  %s2319_s21 = sphi %s2411_s21, %s2917_s21  }
   0x4   : > { %p31_p0 = scmp.ge.s32.totalorder %s29_s26, 2  ;;  %p46_p2 = scmp.eq.s32.totalorder %s2335_s25, 0 }
   0x5   : > { %s38_s29 = sadd.s32 1, %s2323_s22  ;;  %p2106_p5 = scmp.ge.s32.totalorder %s2335_s25, 2 }
   0x6   : > { %s2922_s26 = smov (%p31_p0, %s29_s26), 0  ;;  %p2442_p3 = por %p46_p2, %p45_p1 }
   0x7   : > { %s33_s28 = ssub.s32 %s2331_s24, %s2922_s26  ;;  %233 = sbr.rel (%p2106_p5) target bundleno = 28 (0x1c), region = 24 }
   0x8   : > { %p36_p4 = scmp.eq.s32.totalorder %s33_s28, 0 }
   0xa   : > { %s2450_s30 = scalar_select %p36_p4, %s2323_s22, %s38_s29  }
   0xe   : > { %236 = sbr.rel (!%p2442_p3) target bundleno = 21 (0x15), region = 28  ;;  %s238_s7 = sand.u32 (%p2442_p3), 1, %s2323_s22  }
   0xf   : > { %s2171_s8 = sshll.u32 (%p2442_p3), %s2331_s24, 6  ;;  %s2107_s9 = sshll.u32 (%p2442_p3), %s238_s7, 5 }
  0x10   : > { %s245_s12 = scalar_lea.vmem (%p2442_p3), %s2909_s0, %s2171_s8  ;;  %s240_s13 = scalar_lea.vmem (%p2442_p3), [#allocation2], %s2107_s9 }
  0x11   : > { %v261_v0 = vld [vmem:[%s245_s12] sm:$0xff] (%p2442_p3)   ;;  %v265_v1 = vld [vmem:[%s245_s12 + $0x10] sm:$0xff] (%p2442_p3)  }
  0x12   : > { %v269_v2 = vld [vmem:[%s245_s12 + $0x20] sm:$0xff] (%p2442_p3)   ;;  %262 = vst [vmem:[%s240_s13] sm:$0xff] (%p2442_p3), %v261_v0   ;;  %266 = vst [vmem:[%s240_s13 + $0x8] sm:$0xff] (%p2442_p3), %v265_v1   ;;  %v273_v3 = vld [vmem:[%s245_s12 + $0x30] sm:$0xff] (%p2442_p3)  }
  0x13   : > { %270 = vst [vmem:[%s240_s13 + $0x10] sm:$0xff] (%p2442_p3), %v269_v2   ;;  %274 = vst [vmem:[%s240_s13 + $0x18] sm:$0xff] (%p2442_p3), %v273_v3  }
  0x15 PF: > { %315 = sbr.rel (!%p2442_p3) target bundleno = 28 (0x1c), region = 69  ;;  %s317_s14 = sand.u32 (%p2442_p3), 1, %s2323_s22  }
  0x16   : > { %s2172_s15 = sshll.u32 (%p2442_p3), %s2331_s24, 6  ;;  %s2110_s16 = sshll.u32 (%p2442_p3), %s317_s14, 5 }
  0x17   : > { %s2000_s19 = scalar_lea.vmem (%p2442_p3), %s2910_s1, %s2172_s15  ;;  %s319_s20 = scalar_lea.vmem (%p2442_p3), [#allocation3], %s2110_s16 }
  0x18   : > { %v2113_v4 = vld [vmem:[%s2000_s19 + $0x8] sm:$0xff] (%p2442_p3)   ;;  %v2115_v5 = vld [vmem:[%s2000_s19 + $0x18] sm:$0xff] (%p2442_p3)  }
  0x19   : > { %v2117_v6 = vld [vmem:[%s2000_s19 + $0x28] sm:$0xff] (%p2442_p3)   ;;  %342 = vst [vmem:[%s319_s20] sm:$0xff] (%p2442_p3), %v2113_v4   ;;  %346 = vst [vmem:[%s319_s20 + $0x8] sm:$0xff] (%p2442_p3), %v2115_v5   ;;  %v2119_v7 = vld [vmem:[%s2000_s19 + $0x38] sm:$0xff] (%p2442_p3)  }
  0x1a   : > { %350 = vst [vmem:[%s319_s20 + $0x10] sm:$0xff] (%p2442_p3), %v2117_v6   ;;  %354 = vst [vmem:[%s319_s20 + $0x18] sm:$0xff] (%p2442_p3), %v2119_v7  }
  0x1c PF: > { %p2121_p6 = scmp.ge.s32.totalorder %s2335_s25, 1  ;;  %p394_p7 = scmp.lt.s32.totalorder %s2335_s25, 3 }
  0x1e   : > { %p395_p8 = pnand %p2121_p6, %p394_p7 }
  0x1f   : > { %s401_s27 = sand.u32 (!%p395_p8), 1, %s2319_s21   ;;  %v523_v8 = vlaneseq (!%p395_p8)  ;;  %v2337_v9 = vmov (!%p395_p8), 1983009808   ;;  %v2338_v11 = vmov (!%p395_p8), 1934713408   ;;  %s2339_s7 = smov (!%p395_p8), 72  }
  0x20   : > { %398 = sbr.rel (%p395_p8) target bundleno = 1156 (0x484), region = 110  ;;  %s2122_s28 = sshll.u32 (!%p395_p8), %s401_s27, 5  ;;  %v521_v10 = vunpack.c.l.s4 (!%p395_p8), %v2337_v9  ;;  %v538_v12 = vunpack.c.l.s4 (!%p395_p8), %v2338_v11  ;;  %vm730_vm0 = vcmask (!%p395_p8), 146432   ;;  %vm734_vm1 = vcmask (!%p395_p8), 293888  }
  0x21   : > { %v2471_v13 = vshrl.u32 (!%p395_p8), %v523_v8, 7  ;;  %s410_s29 = scalar_lea.vmem (!%p395_p8), [#allocation3], %s2122_s28  ;;  %s403_s21 = scalar_lea.vmem (!%p395_p8), [#allocation2], %s2122_s28  ;;  %vm737_vm2 = vcmask (!%p395_p8), 441344   ;;  %vm740_vm3 = vcmask (!%p395_p8), 588800   ;;  %vm743_vm4 = vcmask (!%p395_p8), 736256  }
  0x22   : > { %v491_v14 = vld [vmem:[%s410_s29] sm:$0xf] (!%p395_p8)  ;;  %v492_v15 = vld [vmem:[%s410_s29 + $0x8] sm:$0xf] (!%p395_p8)  ;;  %v493_v16 = vld [vmem:[%s410_s29 + $0x10] sm:$0xf] (!%p395_p8)  ;;  %v522_v17 = vunpack.c.0.s8 (!%p395_p8), %v521_v10  ;;  %v539_v18 = vunpack.c.0.s8 (!%p395_p8), %v538_v12 }
  0x23   : > { %v494_v19 = vld [vmem:[%s410_s29 + $0x18] sm:$0xf] (!%p395_p8)  ;;  %v778_v20 = vpack.i.b16 (!%p395_p8), %v492_v15, %v491_v14  ;;  %v779_v21 = vshrl.u32 (!%p395_p8), %v491_v14, 16  ;;  %v780_v22 = vshrl.u32 (!%p395_p8), %v492_v15, 16  ;;  %v785_v23 = vshrl.u32 (!%p395_p8), %v493_v16, 16  ;;  %s2340_s8 = smov (!%p395_p8), 36  }
  0x24   : > { %v2474_v24 = vsub.s32 (!%p395_p8), %v522_v17, %v2471_v13  ;;  %v784_v25 = vpack.i.b16 (!%p395_p8), %v494_v19, %v493_v16  ;;  %v786_v26 = vshrl.u32 (!%p395_p8), %v494_v19, 16  ;;  %v2476_v27 = vld [vmem:[%s403_s21] sm:$0xf] (!%p395_p8)  ;;  %v2479_v28 = vsub.s32 (!%p395_p8), %v539_v18, %v2471_v13  ;;  %v485_v30 = vld [vmem:[%s403_s21 + $0x8] sm:$0xf] (!%p395_p8)  ;;  %s2341_s9 = smov (!%p395_p8), 54  }
  0x25   : > { %v781_v29 = vpack.i.b16 (!%p395_p8), %v780_v22, %v779_v21  ;;  %v487_v31 = vld [vmem:[%s403_s21 + $0x10] sm:$0xf] (!%p395_p8)  ;;  %v489_v35 = vld [vmem:[%s403_s21 + $0x18] sm:$0xf] (!%p395_p8)  ;;  %v498_v36 = vshrl.u32 (!%p395_p8), %v2476_v27, 16  ;;  %v499_v39 = vshrl.u32 (!%p395_p8), %v485_v30, 16  ;;  %v497_v10 = vpack.i.b16 (!%p395_p8), %v485_v30, %v2476_v27 }
  0x26   : > { %v795_v32 = vrot.slane (!%p395_p8), %v778_v20, %v2474_v24  ;;  %v803_v33 = vrot.slane (!%p395_p8), %v784_v25, %v2474_v24  ;;  %v787_v34 = vpack.i.b16 (!%p395_p8), %v786_v26, %v785_v23  ;;  %v484_v37 = vld [vmem:[%s403_s21 + $0x4] sm:$0xf] (!%p395_p8)  ;;  %v504_v40 = vshrl.u32 (!%p395_p8), %v487_v31, 16  ;;  %v486_v42 = vld [vmem:[%s403_s21 + $0xc] sm:$0xf] (!%p395_p8)  ;;  %s2342_s10 = smov (!%p395_p8), 18  }
  0x27   : > { %v829_v38 = vrot.slane %v781_v29, %v2474_v24  ;;  %v505_v41 = vshrl.u32 %v489_v35, 16  ;;  %v488_v46 = vld [vmem:[%s403_s21 + $0x14] sm:$0xf]  ;;  %v490_v47 = vld [vmem:[%s403_s21 + $0x1c] sm:$0xf]  ;;  %v500_v48 = vpack.i.b16 %v499_v39, %v498_v36  ;;  %v509_v50 = vpack.i.b16 %v486_v42, %v484_v37  ;;  %s2343_s11 = smov 108  }
  0x28   : > { %v805_v43 = vcombine.high %v795_v32, %v803_v33  ;;  %v804_v44 = vcombine.low %v795_v32, %v803_v33  ;;  %v837_v45 = vrot.slane %v787_v34, %v2474_v24  ;;  %v515_v51 = vpack.i.b16 %v490_v47, %v488_v46  ;;  %s2344_s12 = smov 90   ;;  %s2345_s13 = smov 126  }
  0x29   : > { %v506_v49 = vpack.i.b16 %v505_v41, %v504_v40  ;;  %v560_v56 = vrot.slane %v500_v48, %v2474_v24  ;;  %v510_v61 = vshrl.u32 %v484_v37, 16  ;;  %v594_v0 = vrot.slane %v509_v50, %v2474_v24  ;;  %s2346_s14 = smov 16   ;;  %s2347_s15 = smov 34  }
  0x2a   : > { %v819_v52 = vrot.slane %v805_v43, %v2479_v28  ;;  %v2488_v53 = vrot.slane %v804_v44, %v2479_v28  ;;  %v838_v54 = vcombine.low %v829_v38, %v837_v45  ;;  %v839_v55 = vcombine.high %v829_v38, %v837_v45  ;;  %s2348_s16 = smov 52   ;;  %s2349_s17 = smov 70  }
  0x2b   : > { %v568_v57 = vrot.slane %v506_v49, %v2474_v24  ;;  %v602_v1 = vrot.slane %v515_v51, %v2474_v24  ;;  %v511_v4 = vshrl.u32 %v486_v42, 16  ;;  %v516_v5 = vshrl.u32 %v488_v46, 16  ;;  %s2350_s18 = smov 88   ;;  %s2351_s19 = smov 106  }
  0x2c   : > { %v2144_v58 = vcombine.low %v819_v52, %v819_v52  ;;  %v2182_v59 = vcombine.high %v2488_v53, %v2488_v53  ;;  %v846_v60 = vrot.slane %v838_v54, %v2479_v28  ;;  %v853_v62 = vrot.slane %v839_v55, %v2479_v28  ;;  %s2352_s20 = smov 124   ;;  %s2353_s27 = smov 14  }
  0x2d   : > { %v570_v63 = vcombine.high %v560_v56, %v568_v57  ;;  %v2184_v6 = vcombine.high %v819_v52, %v819_v52  ;;  %v512_v7 = vpack.i.b16 %v511_v4, %v510_v61  ;;  %v517_v9 = vshrl.u32 %v490_v47, 16  ;;  %s2354_s28 = smov 32   ;;  %s2355_s29 = smov 109  }
  0x2e   : > { %874 = vrot.lane.b32.xlu1 %v2144_v58, %s2339_s7  ;;  %864 = vrot.lane.b32.xlu0 %v2182_v59, %s2340_s8  ;;  %v2183_v2 = vcombine.high %v846_v60, %v846_v60  ;;  %v2141_v3 = vcombine.low %v846_v60, %v846_v60  ;;  %v2145_v11 = vcombine.low %v853_v62, %v853_v62  ;;  %vm746_vm5 = vcmask 883712   ;;  %s2356_s21 = smov 127   ;;  %p461_p9 = scmp.lt.s32.totalorder %s2327_s23, 1 }
  0x2f   : > { %v603_v12 = vcombine.low %v594_v0, %v602_v1  ;;  %v569_v14 = vcombine.low %v560_v56, %v568_v57  ;;  %v503_v15 = vpack.i.b16 %v489_v35, %v487_v31  ;;  %v584_v16 = vrot.slane %v570_v63, %v2479_v28 }
  0x30   : > { %v518_v17 = vpack.i.b16 %v517_v9, %v516_v5  ;;  %v628_v18 = vrot.slane %v512_v7, %v2474_v24  ;;  %v526_v19 = vrot.slane %v497_v10, %v2474_v24  ;;  %v2185_v22 = vcombine.high %v853_v62, %v853_v62  ;;  %s2924_s23 = smov (!%p461_p9, %s2327_s23), 1 }
  0x31   : > { %v534_v20 = vrot.slane %v503_v15, %v2474_v24  ;;  %v611_v23 = vrot.slane %v603_v12, %v2479_v28  ;;  %v577_v25 = vrot.slane %v569_v14, %v2479_v28  ;;  %v2177_v26 = vcombine.high %v584_v16, %v584_v16 }
  0x32   : > { %869 = vrot.lane.b32.xlu1 %v2183_v2, %s2341_s9  ;;  %859 = vrot.lane.b32.xlu0 %v2141_v3, %s2342_s10  ;;  %v636_v21 = vrot.slane %v518_v17, %v2474_v24  ;;  %v604_v37 = vcombine.high %v594_v0, %v602_v1  ;;  %v2130_v46 = vcombine.low %v584_v16, %v584_v16  ;;  %vm749_vm6 = vcmask 1031168  }
  0x33   : > { %v535_v29 = vcombine.low %v526_v19, %v534_v20  ;;  %v2133_v30 = vcombine.low %v611_v23, %v611_v23  ;;  %v2126_v31 = vcombine.low %v577_v25, %v577_v25  ;;  %v536_v36 = vcombine.high %v526_v19, %v534_v20 }
  0x34   : > { %v637_v27 = vcombine.low %v628_v18, %v636_v21  ;;  %v2178_v38 = vcombine.high %v611_v23, %v611_v23  ;;  %v2175_v39 = vcombine.high %v577_v25, %v577_v25  ;;  %v618_v41 = vrot.slane %v604_v37, %v2479_v28 }
  0x35   : > { %v2515_v33 = vrot.slane %v535_v29, %v2479_v28  ;;  %v550_v40 = vrot.slane %v536_v36, %v2479_v28  ;;  %v638_v44 = vcombine.high %v628_v18, %v636_v21  ;;  %vm752_vm7 = vcmask 130048  }
  0x36   : > { %884 = vrot.lane.b32.xlu1 %v2184_v6, %s2343_s11  ;;  %879 = vrot.lane.b32.xlu0 %v2145_v11, %s2344_s12  ;;  %v645_v32 = vrot.slane %v637_v27, %v2479_v28  ;;  %v2137_v45 = vcombine.low %v618_v41, %v618_v41  ;;  %v2180_v49 = vcombine.high %v618_v41, %v618_v41  ;;  %vm755_vm8 = vcmask 277504  }
  0x37   : > { %v2174_v35 = vcombine.high %v2515_v33, %v2515_v33  ;;  %v2129_v43 = vcombine.low %v550_v40, %v550_v40  ;;  %v652_v47 = vrot.slane %v638_v44, %v2479_v28  ;;  %v2176_v50 = vcombine.high %v550_v40, %v550_v40 }
  0x38   : > { %v2134_v34 = vcombine.low %v645_v32, %v645_v32  ;;  %v2179_v42 = vcombine.high %v645_v32, %v645_v32  ;;  %vm758_vm9 = vcmask 424960   ;;  %vm761_vm10 = vcmask 572416  }
  0x39   : > { %v2138_v48 = vcombine.low %v652_v47, %v652_v47  ;;  %v2181_v51 = vcombine.high %v652_v47, %v652_v47  ;;  %vm764_vm11 = vcmask 719872   ;;  %vm767_vm12 = vcmask 867328  }
  0x3a   : > { %889 = vrot.lane.b32.xlu0 %v2185_v22, %s2345_s13  ;;  %688 = vrot.lane.b32.xlu1 %v2177_v26, %s2345_s13  ;;  %vm770_vm13 = vcmask 1014784   ;;  %v2360_v40 = vmov 0.0   ;;  %vm773_vm14 = vcmask 113664   ;;  %vm909_vm15 = vcmask 261120  }
  0x3b   : > { %2206 = vmatprep.subr.bf16.mxu1 %v2360_v40 }
  0x3e   : > { %693 = vrot.lane.b32.xlu0 %v2133_v30, %s2346_s14  ;;  %658 = vrot.lane.b32.xlu1 %v2126_v31, %s2342_s10  ;;  %s2363_s14 = smov 4  }
  0x42   : > { %698 = vrot.lane.b32.xlu0 %v2134_v34, %s2347_s15  ;;  %663 = vrot.lane.b32.xlu1 %v2174_v35, %s2340_s8  ;;  %s2358_s8 = smov 92   ;;  %s2364_s15 = smov 2  }
  0x46   : > { %703 = vrot.lane.b32.xlu0 %v2178_v38, %s2348_s16  ;;  %668 = vrot.lane.b32.xlu1 %v2175_v39, %s2341_s9  ;;  %s2359_s9 = smov 91   ;;  %s2365_s16 = smov 56  }
  0x4a   : > { %708 = vrot.lane.b32.xlu0 %v2179_v42, %s2349_s17  ;;  %673 = vrot.lane.b32.xlu1 %v2129_v43, %s2339_s7  ;;  %s2357_s7 = smov 110   ;;  %s2366_s17 = smov 74  }
  0x4e   : > { %713 = vrot.lane.b32.xlu0 %v2137_v45, %s2350_s18  ;;  %678 = vrot.lane.b32.xlu1 %v2130_v46, %s2344_s12  ;;  %s2367_s18 = smov 20  }
  0x52   : > { %718 = vrot.lane.b32.xlu0 %v2138_v48, %s2351_s19  ;;  %723 = vrot.lane.b32.xlu1 %v2180_v49, %s2352_s20  ;;  %v2362_v48 = vmov 0   ;;  %v1045_v49 = vld [vmem:[%s2912_s3] sm:$0xff]  ;;  %s2368_s19 = smov 38   ;;  %s2369_s20 = smov 94  }
  0x53   : > { %1095 = vmatprep.mubr.bf16.mxu0 %v2362_v48  ;;  %2295 = vset.pattern.permute.xlu1 %v2362_v48 }
  0x54   : > { %2296 = vset.pattern.permute.xlu0 %v2362_v48  ;;  %v1044_v48 = vld [vmem:[%s2911_s2] sm:$0xf] }
  0x56   : > { %683 = vrot.lane.b32.xlu1 %v2176_v50, %s2343_s11  ;;  %728 = vrot.lane.b32.xlu0 %v2181_v51, %s2353_s27  ;;  %s2370_s27 = smov 112  }
  0xa0   : > { %v875_v52 = vpop.permute.xlu1 %874  ;;  %v865_v54 = vpop.permute.xlu0 %864 }
  0xa4   : > { %v870_v55 = vpop.permute.xlu1 %869  ;;  %v860_v56 = vpop.permute.xlu0 %859 }
  0xa5   : > { %v893_v57 = vsel %vm730_vm0, %v2488_v53, %v860_v56 }
  0xa6   : > { %v895_v58 = vsel %vm734_vm1, %v893_v57, %v865_v54 }
  0xa7   : > { %v897_v59 = vsel %vm737_vm2, %v895_v58, %v870_v55 }
  0xa8   : > { %v885_v60 = vpop.permute.xlu1 %884  ;;  %v899_v61 = vsel %vm740_vm3, %v897_v59, %v875_v52  ;;  %v880_v62 = vpop.permute.xlu0 %879 }
  0xa9   : > { %v901_v63 = vsel %vm743_vm4, %v899_v61, %v880_v62 }
  0xaa   : > { %v903_v2 = vsel %vm746_vm5, %v901_v63, %v885_v60 }
  0xac   : > { %v890_v0 = vpop.permute.xlu0 %889  ;;  %v689_v1 = vpop.permute.xlu1 %688 }
  0xad   : > { %v905_v53 = vsel %vm749_vm6, %v903_v2, %v890_v0 }
  0xae   : > { %907 = vrot.lane.b32.xlu0 %v905_v53, %s2354_s28  ;;  %s2371_s28 = smov 58  }
  0xb0   : > { %v694_v3 = vpop.permute.xlu0 %693  ;;  %v659_v4 = vpop.permute.xlu1 %658 }
  0xb1   : > { %v754_v7 = vsel %vm752_vm7, %v689_v1, %v694_v3  ;;  %v733_v12 = vsel %vm730_vm0, %v2515_v33, %v659_v4 }
  0xb4   : > { %v699_v5 = vpop.permute.xlu0 %698  ;;  %v664_v6 = vpop.permute.xlu1 %663 }
  0xb5   : > { %v757_v11 = vsel %vm755_vm8, %v754_v7, %v699_v5  ;;  %v736_v17 = vsel %vm734_vm1, %v733_v12, %v664_v6  ;;  %vm996_vm8 = vcmask 1041408  }
  0xb8   : > { %v704_v9 = vpop.permute.xlu0 %703  ;;  %v669_v10 = vpop.permute.xlu1 %668 }
  0xb9   : > { %v760_v14 = vsel %vm758_vm9, %v757_v11, %v704_v9  ;;  %v739_v19 = vsel %vm737_vm2, %v736_v17, %v669_v10  ;;  %vm2361_vm2 = vmmov 0   ;;  %vm948_vm9 = vcmask 900096  }
  0xba   : > { %2212 = vmatprep.mubr.msk.bf16.mxu1 %vm2361_vm2, %v2360_v40  ;;  %vm1727_vm2 = vcmask 1042434  }
  0xbc   : > { %v709_v15 = vpop.permute.xlu0 %708  ;;  %v674_v16 = vpop.permute.xlu1 %673 }
  0xbd   : > { %v763_v18 = vsel %vm761_vm10, %v760_v14, %v709_v15  ;;  %v742_v23 = vsel %vm740_vm3, %v739_v19, %v674_v16  ;;  %vm924_vm3 = vcmask 1039360   ;;  %vm1003_vm10 = vcmask 1043456  }
  0xc0   : > { %v714_v20 = vpop.permute.xlu0 %713  ;;  %v679_v21 = vpop.permute.xlu1 %678 }
  0xc1   : > { %v766_v22 = vsel %vm764_vm11, %v763_v18, %v714_v20  ;;  %v745_v29 = vsel %vm743_vm4, %v742_v23, %v679_v21  ;;  %vm1010_vm11 = vcmask 1045504  }
  0xc4   : > { %v719_v25 = vpop.permute.xlu0 %718  ;;  %v724_v26 = vpop.permute.xlu1 %723 }
  0xc5   : > { %v769_v27 = vsel %vm767_vm12, %v766_v22, %v719_v25  ;;  %vm957_vm12 = vcmask 891904  }
  0xc6   : > { %v2542_v30 = vsel %vm770_vm13, %v769_v27, %v724_v26  ;;  %vm984_vm13 = vcmask 744448  }
  0xc7   : > { %953 = vrot.lane.b32.xlu0 %v2542_v30, %s2355_s29  ;;  %v916_v31 = vrot.slane %v2542_v30, 6  ;;  %v928_v36 = vrot.slane %v2542_v30, 4  ;;  %v940_v37 = vrot.slane %v2542_v30, 2 }
  0xc8   : > { %v684_v32 = vpop.permute.xlu1 %683  ;;  %v729_v41 = vpop.permute.xlu0 %728 }
  0xc9   : > { %v748_v33 = vsel %vm746_vm5, %v745_v29, %v684_v32  ;;  %920 = vrot.lane.b32.xlu1 %v916_v31, %s2356_s21  ;;  %v775_v42 = vsel %vm773_vm14, %v724_v26, %v729_v41  ;;  %vm1194_vm14 = vcmask 31744  }
  0xca   : > { %v2550_v34 = vsel %vm749_vm6, %v748_v33, %v689_v1 }
  0xcb   : > { %951 = vrot.lane.b32.xlu0 %v2550_v34, %s2355_s29  ;;  %v915_v35 = vrot.slane %v2550_v34, 6  ;;  %v927_v38 = vrot.slane %v2550_v34, 4  ;;  %v939_v39 = vrot.slane %v2550_v34, 2 }
  0xcd   : > { %918 = vrot.lane.b32.xlu1 %v915_v35, %s2356_s21 }
  0xcf   : > { %932 = vrot.lane.b32.xlu0 %v928_v36, %s2345_s13 }
  0xd1   : > { %944 = vrot.lane.b32.xlu1 %v940_v37, %s2357_s7 }
  0xd3   : > { %930 = vrot.lane.b32.xlu0 %v927_v38, %s2345_s13 }
  0xd5   : > { %942 = vrot.lane.b32.xlu1 %v939_v39, %s2357_s7 }
  0xd7   : > { %962 = vrot.lane.b32.xlu0 %v916_v31, %s2343_s11 }
  0xd9   : > { %960 = vrot.lane.b32.xlu1 %v915_v35, %s2343_s11 }
  0xdb   : > { %971 = vrot.lane.b32.xlu0 %v928_v36, %s2358_s8 }
  0xdd   : > { %980 = vrot.lane.b32.xlu1 %v940_v37, %s2359_s9 }
  0xdf   : > { %969 = vrot.lane.b32.xlu0 %v927_v38, %s2358_s8 }
 0x120   : > { %v908_v43 = vpop.permute.xlu0 %907 }
 0x121   : > { %v911_v44 = vsel %vm909_vm15, %v775_v42, %v908_v43  ;;  %vm1725_vm15 = vcmask 1041409  }
 0x122   : > { %955 = vrot.lane.b32.xlu1 %v911_v44, %s2355_s29  ;;  %v917_v45 = vrot.slane %v911_v44, 6  ;;  %v929_v46 = vrot.slane %v911_v44, 4  ;;  %v941_v47 = vrot.slane %v911_v44, 2  ;;  %s2372_s29 = smov 76  }
 0x124   : > { %922 = vrot.lane.b32.xlu0 %v917_v45, %s2356_s21  ;;  %s2373_s21 = smov 22  }
 0x126   : > { %934 = vrot.lane.b32.xlu1 %v929_v46, %s2345_s13 }
 0x128   : > { %946 = vrot.lane.b32.xlu0 %v941_v47, %s2357_s7 }
 0x12a   : > { %964 = vrot.lane.b32.xlu1 %v917_v45, %s2343_s11 }
 0x12c   : > { %982 = vrot.lane.b32.xlu0 %v941_v47, %s2359_s9 }
 0x12e   : > { %973 = vrot.lane.b32.xlu1 %v929_v46, %s2358_s8 }
 0x130   : > { %987 = vrot.lane.b32.xlu0 %v2550_v34, %s2344_s12 }
 0x132   : > { %978 = vrot.lane.b32.xlu1 %v939_v39, %s2359_s9  ;;  %s2173_s9 = sshll.u32 %s2924_s23, 6 }
 0x134   : > { %991 = vrot.lane.b32.xlu0 %v911_v44, %s2344_s12 }
 0x136   : > { %989 = vrot.lane.b32.xlu1 %v2542_v30, %s2344_s12  ;;  %s2670_s12 = scalar_lea.vmem %s2913_s4, %s2173_s9 }
 0x139   : > { %v954_v50 = vpop.permute.xlu0 %953 }
 0x13a   : > { %1048 = vperm.xlu1 %2295, %v1045_v49  }
 0x13b   : > { %v921_v51 = vpop.permute.xlu1 %920 }
 0x13d   : > { %v952_v52 = vpop.permute.xlu0 %951 }
 0x13e   : > { %v958_v21 = vsel %vm957_vm12, %v952_v52, %v954_v50 }
 0x13f   : > { %v919_v54 = vpop.permute.xlu1 %918 }
 0x140   : > { %v925_v1 = vsel %vm924_vm3, %v919_v54, %v921_v51 }
 0x141   : > { %v933_v55 = vpop.permute.xlu0 %932  ;;  %v998_v7 = vsel %vm996_vm8, %v2550_v34, %v925_v1 }
 0x143   : > { %v945_v56 = vpop.permute.xlu1 %944 }
 0x145   : > { %v931_v57 = vpop.permute.xlu0 %930 }
 0x146   : > { %v937_v53 = vsel %vm749_vm6, %v931_v57, %v933_v55 }
 0x147   : > { %v943_v59 = vpop.permute.xlu1 %942  ;;  %v1005_v15 = vsel %vm1003_vm10, %v998_v7, %v937_v53 }
 0x148   : > { %v949_v11 = vsel %vm948_vm9, %v943_v59, %v945_v56 }
 0x149   : > { %v963_v58 = vpop.permute.xlu0 %962  ;;  %v1012_v20 = vsel %vm1010_vm11, %v1005_v15, %v949_v11 }
 0x14b   : > { %v961_v61 = vpop.permute.xlu1 %960 }
 0x14c   : > { %v967_v22 = vsel %vm746_vm5, %v961_v61, %v963_v58 }
 0x14d   : > { %v972_v60 = vpop.permute.xlu0 %971 }
 0x14f   : > { %v981_v62 = vpop.permute.xlu1 %980 }
 0x151   : > { %v970_v63 = vpop.permute.xlu0 %969 }
 0x194   : > { %v956_v0 = vpop.permute.xlu1 %955 }
 0x195   : > { %v959_v26 = vsel %vm957_vm12, %v954_v50, %v956_v0  ;;  %vm1749_vm12 = vcmask 57344  }
 0x196   : > { %v923_v2 = vpop.permute.xlu0 %922 }
 0x197   : > { %v926_v3 = vsel %vm924_vm3, %v921_v51, %v923_v2  ;;  %v1002_v4 = vsel %vm996_vm8, %v911_v44, %v923_v2  ;;  %vm1729_vm3 = vcmask 1043459  }
 0x198   : > { %v1000_v5 = vsel %vm996_vm8, %v2542_v30, %v926_v3  ;;  %v935_v6 = vpop.permute.xlu1 %934  ;;  %v1022_v30 = vsel %vm996_vm8, %v958_v21, %v967_v22  ;;  %v2637_v21 = vand.u32 127, %v523_v8 }
 0x199   : > { %v938_v9 = vsel %vm749_vm6, %v933_v55, %v935_v6  ;;  %v1009_v10 = vsel %vm1003_vm10, %v1002_v4, %v935_v6  ;;  %vm975_vm6 = vcmask 752640  }
 0x19a   : > { %v947_v12 = vpop.permute.xlu0 %946  ;;  %v1007_v14 = vsel %vm1003_vm10, %v1000_v5, %v938_v9  ;;  %v976_v34 = vsel %vm975_vm6, %v970_v63, %v972_v60 }
 0x19b   : > { %v950_v16 = vsel %vm948_vm9, %v945_v56, %v947_v12  ;;  %v1018_v17 = vsel %vm1010_vm11, %v1009_v10, %v947_v12  ;;  %v1030_v43 = vsel %vm1003_vm10, %v1022_v30, %v976_v34  ;;  %vm1733_vm9 = vcmask 1045509  }
 0x19c   : > { %2207 = vmatpush3.bf16.msra.mxu1 %v1018_v17  ;;  %v965_v18 = vpop.permute.xlu1 %964  ;;  %v1015_v19 = vsel %vm1010_vm11, %v1007_v14, %v950_v16 }
 0x19d   : > { %1063 = vmatprep.subr.bf16.mxu0 %v1015_v19  ;;  %2208 = vmatprep.subr.bf16.mxu1 %v2360_v40  ;;  %v968_v23 = vsel %vm746_vm5, %v963_v58, %v965_v18  ;;  %v1028_v27 = vsel %vm996_vm8, %v956_v0, %v965_v18  ;;  %vm1536_vm5 = vcmask 142336  }
 0x19e   : > { %v983_v25 = vpop.permute.xlu0 %982  ;;  %1064 = vmatpush1.bf16.msra.mxu0 %v1012_v20  ;;  %v1025_v31 = vsel %vm996_vm8, %v959_v26, %v968_v23 }
 0x19f   : > { %v986_v35 = vsel %vm984_vm13, %v981_v62, %v983_v25 }
 0x1a0   : > { %v974_v29 = vpop.permute.xlu1 %973 }
 0x1a1   : > { %v977_v32 = vsel %vm975_vm6, %v972_v60, %v974_v29  ;;  %v1034_v33 = vsel %vm1003_vm10, %v1028_v27, %v974_v29 }
 0x1a2   : > { %v988_v36 = vpop.permute.xlu0 %987  ;;  %v1042_v37 = vsel %vm1010_vm11, %v1034_v33, %v983_v25  ;;  %v1032_v38 = vsel %vm1003_vm10, %v1025_v31, %v977_v32  ;;  %vm1735_vm10 = vcmask 1046534  }
 0x1a3   : > { %2209 = vmatpush3.bf16.msra.mxu1 %v1042_v37  ;;  %v1039_v39 = vsel %vm1010_vm11, %v1032_v38, %v986_v35 }
 0x1a4   : > { %1065 = vmatprep.subr.bf16.mxu0 %v1039_v39  ;;  %v979_v41 = vpop.permute.xlu1 %978  ;;  %2210 = vmatprep.subr.bf16.mxu1 %v2360_v40 }
 0x1a5   : > { %v985_v42 = vsel %vm984_vm13, %v979_v41, %v981_v62 }
 0x1a6   : > { %v992_v44 = vpop.permute.xlu0 %991  ;;  %v1036_v45 = vsel %vm1010_vm11, %v1030_v43, %v985_v42  ;;  %vm1737_vm11 = vcmask 1047559  }
 0x1a7   : > { %1066 = vmatpush1.bf16.msra.mxu0 %v1036_v45  ;;  %v1061_v46 = vsel %vm996_vm8, %v992_v44, 0 }
 0x1a8   : > { %2211 = vmatpush3.bf16.msra.mxu1 %v1061_v46  ;;  %v990_v47 = vpop.permute.xlu1 %989 }
 0x1a9   : > { %v994_v49 = vsel %vm743_vm4, %v988_v36, %v990_v47  ;;  %v995_v50 = vsel %vm743_vm4, %v990_v47, %v992_v44  ;;  %vm1562_vm4 = vcmp.lt.s32.totalorder %v2637_v21, 16 }
 0x1aa   : > { %2148 = vmatprep.subr.msk.bf16.mxu0 %vm996_vm8, %v995_v50  ;;  %v1055_v51 = vsel %vm996_vm8, %v994_v49, 0  ;;  %v2658_v45 = vsel %vm1562_vm4, 1.0, %v2360_v40  ;;  %vm1731_vm8 = vcmask 1044484  }
 0x1ab   : > { %1068 = vmatpush1.bf16.msra.mxu0 %v1055_v51  ;;  %2213 = vmatmul.mubr.msk.bf16.vlgmr.msra.gmra.mrb[0].mxu1 %vm734_vm1, %v1044_v48 }
 0x1ae   : > { %2149 = vmatmul.mubr.msk.bf16.vlgmr.msra.gmra.mrb[0].mxu0 %vm734_vm1, %v1044_v48  ;;  %vm1168_vm1 = vcmask 15360  }
 0x1b9   : > { %v1049_v52 = vpop.permute.xlu1 %1048 }
 0x27e   : > { %v1138_v54 = vpop.f32.mrb[0].mxu1 }
 0x27f   : > { %v1139_v55 = vadd.f32 %v1138_v54, %v1049_v52  ;;  %v2214_v56 = vpop.f32.mrb[1].mxu1 }
 0x280   : > { %v1141_v57 = vpop.f32.mrb[2].mxu1 }
 0x281   : > { %v1097_v58 = vpop.f32.mrb[0].mxu0  ;;  %1192 = vrot.lane.b32.xlu1 %v1139_v55, %s2363_s14  ;;  %v2215_v59 = vpop.f32.mrb[3].mxu1 }
 0x282   : > { %v1098_v60 = vadd.f32 %v1097_v58, %v1049_v52  ;;  %v1099_v61 = vpop.f32.mrb[1].mxu0 }
 0x283   : > { %v1101_v62 = vpop.f32.mrb[2].mxu0  ;;  %v1100_v0 = vadd.f32 %v1099_v61, %v1049_v52 }
 0x284   : > { %v1102_v63 = vpop.f32.mrb[3].mxu0  ;;  %1164 = vrot.lane.b32.xlu0 %v1098_v60, %s2364_s15 }
 0x285   : > { %1148 = vrot.lane.b32.xlu1 %v1098_v60, %s2358_s8  ;;  %s2375_s8 = smov 114  }
 0x288   : > { %1145 = vrot.lane.b32.xlu0 %v1098_v60, %s2357_s7  ;;  %s2374_s7 = smov 40  }
 0x289   : > { %1154 = vrot.lane.b32.xlu1 %v1098_v60, %s2365_s16 }
 0x28c   : > { %1151 = vrot.lane.b32.xlu0 %v1098_v60, %s2366_s17 }
 0x28d   : > { %1160 = vrot.lane.b32.xlu1 %v1098_v60, %s2367_s18  ;;  %s481_s18 = scalar_lea.vmem %s2915_s6, %s2924_s23 }
 0x290   : > { %1157 = vrot.lane.b32.xlu0 %v1098_v60, %s2368_s19 }
 0x291   : > { %1166 = vrot.lane.b32.xlu1 %v1100_v0, %s2364_s15  ;;  %s475_s15 = scalar_lea.vmem %s2914_s5, %s2924_s23 }
 0x294   : > { %1190 = vrot.lane.b32.xlu0 %v1100_v0, %s2363_s14 }
 0x295   : > { %1174 = vrot.lane.b32.xlu1 %v1100_v0, %s2369_s20 }
 0x298   : > { %1171 = vrot.lane.b32.xlu0 %v1100_v0, %s2370_s27 }
 0x299   : > { %1180 = vrot.lane.b32.xlu1 %v1100_v0, %s2371_s28 }
 0x29c   : > { %1177 = vrot.lane.b32.xlu0 %v1100_v0, %s2372_s29 }
 0x29d   : > { %1186 = vrot.lane.b32.xlu1 %v1100_v0, %s2373_s21 }
 0x2a0   : > { %1183 = vrot.lane.b32.xlu0 %v1100_v0, %s2374_s7 }
 0x2a4   : > { %1197 = vrot.lane.b32.xlu0 %v1139_v55, %s2375_s8 }
 0x2f3   : > { %v2628_v1 = vpop.permute.xlu1 %1192 }
 0x2f6   : > { %v1165_v2 = vpop.permute.xlu0 %1164 }
 0x2f7   : > { %v1149_v53 = vpop.permute.xlu1 %1148 }
 0x2f8   : > { %v1200_v9 = vcombine.low %v1098_v60, %v1149_v53  ;;  %v1201_v11 = vcombine.high %v1098_v60, %v1149_v53 }
 0x2fa   : > { %v1146_v3 = vpop.permute.xlu0 %1145  ;;  %v1208_v18 = vrot.slane %v1200_v9, %v2474_v24  ;;  %v1215_v25 = vrot.slane %v1201_v11, %v2474_v24 }
 0x2fb   : > { %v1155_v4 = vpop.permute.xlu1 %1154 }
 0x2fe   : > { %v1152_v5 = vpop.permute.xlu0 %1151 }
 0x2ff   : > { %v1216_v6 = vcombine.low %v1146_v3, %v1152_v5  ;;  %v1161_v7 = vpop.permute.xlu1 %1160  ;;  %v1217_v10 = vcombine.high %v1146_v3, %v1152_v5 }
 0x300   : > { %v1232_v14 = vcombine.low %v1155_v4, %v1161_v7  ;;  %v1233_v16 = vcombine.high %v1155_v4, %v1161_v7 }
 0x301   : > { %v1224_v12 = vrot.slane %v1216_v6, %v2474_v24  ;;  %v2634_v19 = vrot.slane %v1217_v10, %v2474_v24 }
 0x302   : > { %v1158_v15 = vpop.permute.xlu0 %1157  ;;  %v1240_v27 = vrot.slane %v1232_v14, %v2474_v24  ;;  %v1247_v31 = vrot.slane %v1233_v16, %v2474_v24 }
 0x303   : > { %v1167_v17 = vpop.permute.xlu1 %1166  ;;  %v1264_v26 = vcombine.low %v1208_v18, %v1224_v12  ;;  %v1265_v30 = vcombine.high %v1208_v18, %v1224_v12  ;;  %v1280_v8 = vcombine.low %v1215_v25, %v2634_v19  ;;  %v1281_v60 = vcombine.high %v1215_v25, %v2634_v19 }
 0x304   : > { %v1169_v20 = vsel %vm1168_vm1, %v1165_v2, %v1167_v17 }
 0x305   : > { %v1248_v22 = vcombine.low %v1158_v15, %v1169_v20  ;;  %v1249_v23 = vcombine.high %v1158_v15, %v1169_v20  ;;  %v1272_v39 = vrot.slane %v1264_v26, %v2479_v28  ;;  %v1279_v42 = vrot.slane %v1265_v30, %v2479_v28 }
 0x306   : > { %v1191_v29 = vpop.permute.xlu0 %1190  ;;  %v1288_v46 = vrot.slane %v1280_v8, %v2479_v28  ;;  %v1295_v11 = vrot.slane %v1281_v60, %v2479_v28 }
 0x307   : > { %v1256_v32 = vrot.slane %v1248_v22, %v2474_v24  ;;  %v1263_v33 = vrot.slane %v1249_v23, %v2474_v24  ;;  %v1175_v37 = vpop.permute.xlu1 %1174  ;;  %v1195_v4 = vsel %vm1194_vm14, %v1191_v29, %v2628_v1 }
 0x309   : > { %v1296_v34 = vcombine.low %v1240_v27, %v1256_v32  ;;  %v1297_v35 = vcombine.high %v1240_v27, %v1256_v32  ;;  %v1312_v36 = vcombine.low %v1247_v31, %v1263_v33  ;;  %v1313_v40 = vcombine.high %v1247_v31, %v1263_v33 }
 0x30a   : > { %v1172_v38 = vpop.permute.xlu0 %1171 }
 0x30b   : > { %v1304_v41 = vrot.slane %v1296_v34, %v2479_v28  ;;  %v1311_v43 = vrot.slane %v1297_v35, %v2479_v28  ;;  %v1320_v44 = vrot.slane %v1312_v36, %v2479_v28  ;;  %v1181_v54 = vpop.permute.xlu1 %1180  ;;  %v1327_v6 = vrot.slane %v1313_v40, %v2479_v28 }
 0x30c   : > { %v1352_v63 = vcombine.low %v1175_v37, %v1181_v54  ;;  %v1353_v5 = vcombine.high %v1175_v37, %v1181_v54 }
 0x30d   : > { %v1328_v47 = vcombine.low %v1272_v39, %v1304_v41  ;;  %v2661_v48 = vcombine.high %v1272_v39, %v1304_v41  ;;  %v2663_v49 = vcombine.low %v1279_v42, %v1311_v43  ;;  %v2665_v50 = vcombine.high %v1279_v42, %v1311_v43 }
 0x30e   : > { %v1178_v51 = vpop.permute.xlu0 %1177  ;;  %v2672_v52 = vcombine.low %v1288_v46, %v1320_v44  ;;  %v2694_v3 = vcombine.high %v1288_v46, %v1320_v44  ;;  %v1360_v12 = vrot.slane %v1352_v63, %v2474_v24  ;;  %v1367_v17 = vrot.slane %v1353_v5, %v2474_v24 }
 0x30f   : > { %v2675_v55 = vmul.f32 %v2658_v45, %v1328_v47  ;;  %v2186_v56 = vpack.c.bf16 %v1328_v47, %v1328_v47  ;;  %v1336_v57 = vcombine.low %v1172_v38, %v1178_v51  ;;  %v2188_v58 = vpack.c.bf16 %v2661_v48, %v2661_v48  ;;  %v1187_v15 = vpop.permute.xlu1 %1186 }
 0x310   : > { %v2190_v59 = vpack.c.bf16 %v2663_v49, %v2663_v49  ;;  %v2192_v62 = vpack.c.bf16 %v2665_v50, %v2665_v50  ;;  %v1337_v0 = vcombine.high %v1172_v38, %v1178_v51  ;;  %v2194_v53 = vpack.c.bf16 %v2672_v52, %v2672_v52 }
 0x311   : > { %v1587_v61 = vsel %vm730_vm0, %v2675_v55, 0.0  ;;  %1537 = vst.msk [vmem:[%s2670_s12] sm:$0xf] %vm1536_vm5, %v2186_v56  ;;  %1539 = vst.msk [vmem:[%s2670_s12 + $0x8] sm:$0xf] %vm1536_vm5, %v2188_v58  ;;  %v1344_v7 = vrot.slane %v1336_v57, %v2474_v24  ;;  %v2196_v16 = vpack.c.bf16 %v2694_v3, %v2694_v3  ;;  %v2710_v20 = vcombine.low %v1295_v11, %v1327_v6 }
 0x312   : > { %1588 = vadd.xlane.f32.xlu1 %v1587_v61  ;;  %v1184_v2 = vpop.permute.xlu0 %1183  ;;  %1541 = vst.msk [vmem:[%s2670_s12 + $0x10] sm:$0xf] %vm1536_vm5, %v2190_v59  ;;  %1543 = vst.msk [vmem:[%s2670_s12 + $0x18] sm:$0xf] %vm1536_vm5, %v2192_v62  ;;  %v1351_v14 = vrot.slane %v1337_v0, %v2474_v24  ;;  %v2715_v26 = vcombine.high %v1295_v11, %v1327_v6  ;;  %v2740_v0 = vmul.f32 %v2658_v45, %v2661_v48 }
 0x313   : > { %v1368_v9 = vcombine.low %v1184_v2, %v1195_v4  ;;  %1545 = vst.msk [vmem:[%s2670_s12 + $0x20] sm:$0xf] %vm1536_vm5, %v2194_v53  ;;  %v1369_v10 = vcombine.high %v1184_v2, %v1195_v4  ;;  %v1400_v22 = vcombine.low %v1344_v7, %v1360_v12  ;;  %v1401_v23 = vcombine.high %v1344_v7, %v1360_v12 }
 0x314   : > { %1547 = vst.msk [vmem:[%s2670_s12 + $0x28] sm:$0xf] %vm1536_vm5, %v2196_v16  ;;  %v2198_v31 = vpack.c.bf16 %v2710_v20, %v2710_v20  ;;  %v1416_v32 = vcombine.low %v1351_v14, %v1367_v17  ;;  %v1417_v33 = vcombine.high %v1351_v14, %v1367_v17  ;;  %v2200_v8 = vpack.c.bf16 %v2715_v26, %v2715_v26 }
 0x315   : > { %v1376_v25 = vrot.slane %v1368_v9, %v2474_v24  ;;  %v1383_v27 = vrot.slane %v1369_v10, %v2474_v24  ;;  %v1408_v38 = vrot.slane %v1400_v22, %v2479_v28  ;;  %v1415_v39 = vrot.slane %v1401_v23, %v2479_v28 }
 0x316   : > { %v1198_v1 = vpop.permute.xlu0 %1197  ;;  %1549 = vst.msk [vmem:[%s2670_s12 + $0x30] sm:$0xf] %vm1536_vm5, %v2198_v31  ;;  %1551 = vst.msk [vmem:[%s2670_s12 + $0x38] sm:$0xf] %vm1536_vm5, %v2200_v8  ;;  %v1424_v44 = vrot.slane %v1416_v32, %v2479_v28  ;;  %v1431_v46 = vrot.slane %v1417_v33, %v2479_v28  ;;  %v1593_v11 = vsel %vm730_vm0, %v2740_v0, 0.0  ;;  %v1575_v14 = vmul.f32 %v2658_v45, %v2663_v49 }
 0x317   : > { %v1384_v18 = vcombine.low %v1187_v15, %v1198_v1  ;;  %v1385_v19 = vcombine.high %v1187_v15, %v1198_v1  ;;  %v1577_v17 = vmul.f32 %v2658_v45, %v2665_v50  ;;  %v1579_v22 = vmul.f32 %v2658_v45, %v2672_v52 }
 0x318   : > { %v1599_v1 = vsel %vm730_vm0, %v1575_v14, 0.0  ;;  %v1581_v50 = vmul.f32 %v2658_v45, %v2694_v3  ;;  %v1583_v52 = vmul.f32 %v2658_v45, %v2710_v20  ;;  %v1585_v3 = vmul.f32 %v2658_v45, %v2715_v26 }
 0x319   : > { %v1392_v29 = vrot.slane %v1384_v18, %v2474_v24  ;;  %v1399_v30 = vrot.slane %v1385_v19, %v2474_v24  ;;  %v1605_v49 = vsel %vm730_vm0, %v1577_v17, 0.0  ;;  %v1751_v20 = vmul.f32 %v2675_v55, %v2675_v55 }
 0x31a   : > { %v1623_v33 = vsel %vm730_vm0, %v1583_v52, 0.0 }
 0x31b   : > { %v1432_v34 = vcombine.low %v1376_v25, %v1392_v29  ;;  %v1433_v35 = vcombine.high %v1376_v25, %v1392_v29  ;;  %v1448_v36 = vcombine.low %v1383_v27, %v1399_v30  ;;  %v1449_v37 = vcombine.high %v1383_v27, %v1399_v30 }
 0x31c   : > { %v1611_v25 = vsel %vm730_vm0, %v1579_v22, 0.0  ;;  %v1617_v30 = vsel %vm730_vm0, %v1581_v50, 0.0 }
 0x31d   : > { %v1440_v24 = vrot.slane %v1432_v34, %v2479_v28  ;;  %v1447_v41 = vrot.slane %v1433_v35, %v2479_v28  ;;  %v1456_v42 = vrot.slane %v1448_v36, %v2479_v28  ;;  %v1463_v43 = vrot.slane %v1449_v37, %v2479_v28 }
 0x31e   : > { %v1629_v35 = vsel %vm730_vm0, %v1585_v3, 0.0 }
 0x31f   : > { %v1465_v47 = vcombine.high %v1408_v38, %v1440_v24  ;;  %v1464_v51 = vcombine.low %v1408_v38, %v1440_v24  ;;  %v1466_v40 = vcombine.low %v1415_v39, %v1447_v41  ;;  %v1467_v54 = vcombine.high %v1415_v39, %v1447_v41 }
 0x320   : > { %v1468_v56 = vcombine.low %v1424_v44, %v1456_v42  ;;  %v1469_v57 = vcombine.high %v1424_v44, %v1456_v42  ;;  %v1470_v58 = vcombine.low %v1431_v46, %v1463_v43  ;;  %v1471_v59 = vcombine.high %v1431_v46, %v1463_v43 }
 0x321   : > { %v1574_v60 = vmul.f32 %v2658_v45, %v1465_v47  ;;  %v2189_v61 = vpack.c.bf16 %v1465_v47, %v1465_v47  ;;  %v1572_v62 = vmul.f32 %v2658_v45, %v1464_v51  ;;  %v2187_v63 = vpack.c.bf16 %v1464_v51, %v1464_v51 }
 0x322   : > { %v2191_v28 = vpack.c.bf16 %v1466_v40, %v1466_v40  ;;  %v2193_v2 = vpack.c.bf16 %v1467_v54, %v1467_v54  ;;  %v1576_v5 = vmul.f32 %v2658_v45, %v1466_v40  ;;  %v2195_v6 = vpack.c.bf16 %v1468_v56, %v1468_v56 }
 0x323   : > { %v1596_v53 = vsel %vm730_vm0, %v1574_v60, 0.0  ;;  %1540 = vst.msk [vmem:[%s2670_s12 + $0xc] sm:$0xf] %vm1536_vm5, %v2189_v61  ;;  %v1590_v4 = vsel %vm730_vm0, %v1572_v62, 0.0  ;;  %1538 = vst.msk [vmem:[%s2670_s12 + $0x4] sm:$0xf] %vm1536_vm5, %v2187_v63  ;;  %v2197_v48 = vpack.c.bf16 %v1469_v57, %v1469_v57  ;;  %v2199_v7 = vpack.c.bf16 %v1470_v58, %v1470_v58 }
 0x324   : > { %1597 = vadd.xlane.f32.xlu1 %v1596_v53  ;;  %1591 = vadd.xlane.f32.xlu0 %v1590_v4  ;;  %1542 = vst.msk [vmem:[%s2670_s12 + $0x14] sm:$0xf] %vm1536_vm5, %v2191_v28  ;;  %1544 = vst.msk [vmem:[%s2670_s12 + $0x1c] sm:$0xf] %vm1536_vm5, %v2193_v2  ;;  %v2201_v9 = vpack.c.bf16 %v1471_v59, %v1471_v59  ;;  %v1602_v10 = vsel %vm730_vm0, %v1576_v5, 0.0  ;;  %v1578_v12 = vmul.f32 %v2658_v45, %v1467_v54 }
 0x325   : > { %1546 = vst.msk [vmem:[%s2670_s12 + $0x24] sm:$0xf] %vm1536_vm5, %v2195_v6  ;;  %1548 = vst.msk [vmem:[%s2670_s12 + $0x2c] sm:$0xf] %vm1536_vm5, %v2197_v48  ;;  %v1580_v16 = vmul.f32 %v2658_v45, %v1468_v56  ;;  %v1582_v19 = vmul.f32 %v2658_v45, %v1469_v57  ;;  %v1584_v27 = vmul.f32 %v2658_v45, %v1470_v58  ;;  %v1767_v38 = vsel %vm730_vm0, %v1751_v20, 0.0 }
 0x326   : > { %1550 = vst.msk [vmem:[%s2670_s12 + $0x34] sm:$0xf] %vm1536_vm5, %v2199_v7  ;;  %1552 = vst.msk [vmem:[%s2670_s12 + $0x3c] sm:$0xf] %vm1536_vm5, %v2201_v9  ;;  %v1608_v15 = vsel %vm730_vm0, %v1578_v12, 0.0  ;;  %v1586_v31 = vmul.f32 %v2658_v45, %v1471_v59  ;;  %v1752_v8 = vmul.f32 %v1572_v62, %v1572_v62  ;;  %v1754_v36 = vmul.f32 %v1574_v60, %v1574_v60 }
 0x327   : > { %v1614_v18 = vsel %vm730_vm0, %v1580_v16, 0.0  ;;  %v1620_v23 = vsel %vm730_vm0, %v1582_v19, 0.0  ;;  %v1626_v29 = vsel %vm730_vm0, %v1584_v27, 0.0  ;;  %v1756_v39 = vmul.f32 %v1576_v5, %v1576_v5 }
 0x328   : > { %1603 = vadd.xlane.f32.xlu1 %v1602_v10  ;;  %1594 = vadd.xlane.f32.xlu0 %v1593_v11  ;;  %v1632_v32 = vsel %vm730_vm0, %v1586_v31, 0.0  ;;  %v1770_v34 = vsel %vm730_vm0, %v1752_v8, 0.0  ;;  %v1776_v37 = vsel %vm730_vm0, %v1754_v36, 0.0  ;;  %v1753_v45 = vmul.f32 %v2740_v0, %v2740_v0 }
 0x329   : > { %v1782_v26 = vsel %vm730_vm0, %v1756_v39, 0.0  ;;  %v1758_v41 = vmul.f32 %v1578_v12, %v1578_v12  ;;  %v1755_v42 = vmul.f32 %v1575_v14, %v1575_v14  ;;  %v1760_v44 = vmul.f32 %v1580_v16, %v1580_v16 }
 0x32a   : > { %v1773_v24 = vsel %vm730_vm0, %v1753_v45, 0.0  ;;  %v1757_v46 = vmul.f32 %v1577_v17, %v1577_v17  ;;  %v1762_v40 = vmul.f32 %v1582_v19, %v1582_v19  ;;  %v1759_v54 = vmul.f32 %v1579_v22, %v1579_v22 }
 0x32b   : > { %v1788_v55 = vsel %vm730_vm0, %v1758_v41, 0.0  ;;  %v1779_v43 = vsel %vm730_vm0, %v1755_v42, 0.0  ;;  %v1794_v47 = vsel %vm730_vm0, %v1760_v44, 0.0  ;;  %v1764_v58 = vmul.f32 %v1584_v27, %v1584_v27 }
 0x32c   : > { %1609 = vadd.xlane.f32.xlu1 %v1608_v15  ;;  %1600 = vadd.xlane.f32.xlu0 %v1599_v1  ;;  %v1785_v51 = vsel %vm730_vm0, %v1757_v46, 0.0  ;;  %v1800_v56 = vsel %vm730_vm0, %v1762_v40, 0.0  ;;  %v1791_v57 = vsel %vm730_vm0, %v1759_v54, 0.0  ;;  %v1761_v59 = vmul.f32 %v1581_v50, %v1581_v50 }
 0x32d   : > { %v1806_v60 = vsel %vm730_vm0, %v1764_v58, 0.0  ;;  %v1766_v62 = vmul.f32 %v1586_v31, %v1586_v31  ;;  %v1763_v63 = vmul.f32 %v1583_v52, %v1583_v52  ;;  %v1765_v2 = vmul.f32 %v1585_v3, %v1585_v3 }
 0x32e   : > { %v1797_v61 = vsel %vm730_vm0, %v1761_v59, 0.0  ;;  %v1655_v14 = vadd.s32 4294967288, %v2637_v21  ;;  %v2815_v16 = vsub.s32 %v2637_v21, %v2471_v13 }
 0x32f   : > { %v1812_v28 = vsel %vm730_vm0, %v1766_v62, 0.0  ;;  %v1803_v0 = vsel %vm730_vm0, %v1763_v63, 0.0  ;;  %v1809_v53 = vsel %vm730_vm0, %v1765_v2, 0.0  ;;  %vm1660_vm0 = vcmask 130112  }
 0x330   : > { %1615 = vadd.xlane.f32.xlu1 %v1614_v18  ;;  %1606 = vadd.xlane.f32.xlu0 %v1605_v49  ;;  %v2818_v17 = vsub.s32 %v1655_v14, %v2471_v13 }
 0x334   : > { %1621 = vadd.xlane.f32.xlu1 %v1620_v23  ;;  %1612 = vadd.xlane.f32.xlu0 %v1611_v25 }
 0x338   : > { %1627 = vadd.xlane.f32.xlu1 %v1626_v29  ;;  %1618 = vadd.xlane.f32.xlu0 %v1617_v30 }
 0x33c   : > { %1633 = vadd.xlane.f32.xlu1 %v1632_v32  ;;  %1624 = vadd.xlane.f32.xlu0 %v1623_v33 }
 0x340   : > { %1771 = vadd.xlane.f32.xlu1 %v1770_v34  ;;  %1630 = vadd.xlane.f32.xlu0 %v1629_v35 }
 0x344   : > { %1777 = vadd.xlane.f32.xlu1 %v1776_v37  ;;  %1768 = vadd.xlane.f32.xlu0 %v1767_v38 }
 0x348   : > { %1783 = vadd.xlane.f32.xlu1 %v1782_v26  ;;  %1774 = vadd.xlane.f32.xlu0 %v1773_v24 }
 0x34c   : > { %1789 = vadd.xlane.f32.xlu1 %v1788_v55  ;;  %1780 = vadd.xlane.f32.xlu0 %v1779_v43 }
 0x350   : > { %1795 = vadd.xlane.f32.xlu1 %v1794_v47  ;;  %1786 = vadd.xlane.f32.xlu0 %v1785_v51 }
 0x354   : > { %1801 = vadd.xlane.f32.xlu1 %v1800_v56  ;;  %1792 = vadd.xlane.f32.xlu0 %v1791_v57 }
 0x358   : > { %1807 = vadd.xlane.f32.xlu1 %v1806_v60  ;;  %1798 = vadd.xlane.f32.xlu0 %v1797_v61 }
 0x35c   : > { %1813 = vadd.xlane.f32.xlu1 %v1812_v28  ;;  %1804 = vadd.xlane.f32.xlu0 %v1803_v0 }
 0x360   : > { %1810 = vadd.xlane.f32.xlu0 %v1809_v53 }
 0x39f   : > { %v1589_v4 = vpop.xlane.xlu1 %1588 }
 0x3a0   : > { %v1654_v13 = vrot.slane %v1589_v4, %v2815_v16 }
 0x3b1   : > { %v1598_v5 = vpop.xlane.xlu1 %1597  ;;  %v1592_v6 = vpop.xlane.xlu0 %1591 }
 0x3b2   : > { %v1669_v23 = vrot.slane %v1598_v5, %v2818_v17  ;;  %v1659_v25 = vrot.slane %v1592_v6, %v2818_v17 }
 0x3b4   : > { %v1661_v3 = vsel %vm1660_vm0, %v1659_v25, %v1654_v13 }
 0x3b5   : > { %v1604_v48 = vpop.xlane.xlu1 %1603  ;;  %v1595_v7 = vpop.xlane.xlu0 %1594 }
 0x3b6   : > { %v1665_v18 = vrot.slane %v1595_v7, %v2815_v16  ;;  %v1678_v50 = vrot.slane %v1604_v48, %v2818_v17 }
 0x3b8   : > { %v1670_v29 = vsel %vm1660_vm0, %v1669_v23, %v1665_v18 }
 0x3b9   : > { %v1610_v9 = vpop.xlane.xlu1 %1609  ;;  %v1601_v10 = vpop.xlane.xlu0 %1600  ;;  %v1726_v20 = vsel %vm1725_vm15, %v1670_v29, %v1661_v3 }
 0x3ba   : > { %v1674_v49 = vrot.slane %v1601_v10, %v2815_v16  ;;  %v1687_v30 = vrot.slane %v1610_v9, %v2818_v17 }
 0x3bc   : > { %v1679_v52 = vsel %vm1660_vm0, %v1678_v50, %v1674_v49 }
 0x3bd   : > { %v1616_v11 = vpop.xlane.xlu1 %1615  ;;  %v1607_v12 = vpop.xlane.xlu0 %1606  ;;  %v1728_v39 = vsel %vm1727_vm2, %v1679_v52, %v1726_v20 }
 0x3be   : > { %v1683_v27 = vrot.slane %v1607_v12, %v2815_v16  ;;  %v1696_v32 = vrot.slane %v1616_v11, %v2818_v17 }
 0x3c0   : > { %v1688_v34 = vsel %vm1660_vm0, %v1687_v30, %v1683_v27 }
 0x3c1   : > { %v1622_v15 = vpop.xlane.xlu1 %1621  ;;  %v1613_v1 = vpop.xlane.xlu0 %1612  ;;  %v1730_v26 = vsel %vm1729_vm3, %v1688_v34, %v1728_v39 }
 0x3c2   : > { %v1692_v21 = vrot.slane %v1613_v1, %v2815_v16  ;;  %v1705_v35 = vrot.slane %v1622_v15, %v2818_v17 }
 0x3c4   : > { %v1697_v37 = vsel %vm1660_vm0, %v1696_v32, %v1692_v21 }
 0x3c5   : > { %v1628_v19 = vpop.xlane.xlu1 %1627  ;;  %v1619_v22 = vpop.xlane.xlu0 %1618  ;;  %v1732_v55 = vsel %vm1731_vm8, %v1697_v37, %v1730_v26 }
 0x3c6   : > { %v1701_v31 = vrot.slane %v1619_v22, %v2815_v16  ;;  %v1714_v38 = vrot.slane %v1628_v19, %v2818_v17 }
 0x3c8   : > { %v1706_v45 = vsel %vm1660_vm0, %v1705_v35, %v1701_v31 }
 0x3c9   : > { %v1634_v33 = vpop.xlane.xlu1 %1633  ;;  %v1625_v8 = vpop.xlane.xlu0 %1624  ;;  %v1734_v46 = vsel %vm1733_vm9, %v1706_v45, %v1732_v55 }
 0x3ca   : > { %v1710_v36 = vrot.slane %v1625_v8, %v2815_v16  ;;  %v1723_v43 = vrot.slane %v1634_v33, %v2818_v17 }
 0x3cc   : > { %v1715_v24 = vsel %vm1660_vm0, %v1714_v38, %v1710_v36 }
 0x3cd   : > { %v1772_v41 = vpop.xlane.xlu1 %1771  ;;  %v1631_v42 = vpop.xlane.xlu0 %1630  ;;  %v1736_v51 = vsel %vm1735_vm10, %v1715_v24, %v1734_v46 }
 0x3ce   : > { %v1719_v44 = vrot.slane %v1631_v42, %v2815_v16  ;;  %v1838_v11 = vrot.slane %v1772_v41, %v2818_v17 }
 0x3d0   : > { %v1724_v47 = vsel %vm1660_vm0, %v1723_v43, %v1719_v44 }
 0x3d1   : > { %v1778_v40 = vpop.xlane.xlu1 %1777  ;;  %v1769_v54 = vpop.xlane.xlu0 %1768  ;;  %v1738_v56 = vsel %vm1737_vm11, %v1724_v47, %v1736_v51 }
 0x3d2   : > { %v1740_v57 = vsel %vm752_vm7, %v1738_v56, 0.0  ;;  %v1847_v6 = vrot.slane %v1778_v40, %v2818_v17  ;;  %v1834_v48 = vrot.slane %v1769_v54, %v2815_v16 }
 0x3d3   : > { %1741 = vadd.xlane.f32.xlu0 %v1740_v57 }
 0x3d4   : > { %v1839_v19 = vsel %vm1660_vm0, %v1838_v11, %v1834_v48 }
 0x3d5   : > { %v1784_v58 = vpop.xlane.xlu1 %1783  ;;  %v1775_v59 = vpop.xlane.xlu0 %1774 }
 0x3d6   : > { %v1843_v2 = vrot.slane %v1775_v59, %v2815_v16  ;;  %v1856_v9 = vrot.slane %v1784_v58, %v2818_v17 }
 0x3d8   : > { %v1848_v12 = vsel %vm1660_vm0, %v1847_v6, %v1843_v2 }
 0x3d9   : > { %v1790_v60 = vpop.xlane.xlu1 %1789  ;;  %v1781_v61 = vpop.xlane.xlu0 %1780  ;;  %v1903_v27 = vsel %vm1725_vm15, %v1848_v12, %v1839_v19 }
 0x3da   : > { %v1852_v53 = vrot.slane %v1781_v61, %v2815_v16  ;;  %v1865_v14 = vrot.slane %v1790_v60, %v2818_v17 }
 0x3dc   : > { %v1857_v1 = vsel %vm1660_vm0, %v1856_v9, %v1852_v53 }
 0x3dd   : > { %v1796_v62 = vpop.xlane.xlu1 %1795  ;;  %v1787_v63 = vpop.xlane.xlu0 %1786  ;;  %v1904_v29 = vsel %vm1727_vm2, %v1857_v1, %v1903_v27 }
 0x3de   : > { %v1861_v7 = vrot.slane %v1787_v63, %v2815_v16  ;;  %v1874_v18 = vrot.slane %v1796_v62, %v2818_v17 }
 0x3e0   : > { %v1866_v22 = vsel %vm1660_vm0, %v1865_v14, %v1861_v7 }
 0x3e1   : > { %v1802_v28 = vpop.xlane.xlu1 %1801  ;;  %v1793_v0 = vpop.xlane.xlu0 %1792  ;;  %v1905_v31 = vsel %vm1729_vm3, %v1866_v22, %v1904_v29 }
 0x3e2   : > { %v1870_v10 = vrot.slane %v1793_v0, %v2815_v16  ;;  %v1883_v23 = vrot.slane %v1802_v28, %v2818_v17 }
 0x3e4   : > { %v1875_v50 = vsel %vm1660_vm0, %v1874_v18, %v1870_v10 }
 0x3e5   : > { %v1808_v4 = vpop.xlane.xlu1 %1807  ;;  %v1799_v5 = vpop.xlane.xlu0 %1798  ;;  %v1906_v33 = vsel %vm1731_vm8, %v1875_v50, %v1905_v31 }
 0x3e6   : > { %v1879_v15 = vrot.slane %v1799_v5, %v2815_v16  ;;  %v1892_v21 = vrot.slane %v1808_v4, %v2818_v17 }
 0x3e8   : > { %v1884_v30 = vsel %vm1660_vm0, %v1883_v23, %v1879_v15 }
 0x3e9   : > { %v1805_v49 = vpop.xlane.xlu0 %1804  ;;  %v1814_v13 = vpop.xlane.xlu1 %1813  ;;  %v1907_v34 = vsel %vm1733_vm9, %v1884_v30, %v1906_v33 }
 0x3ea   : > { %v1888_v25 = vrot.slane %v1805_v49, %v2815_v16  ;;  %v1901_v8 = vrot.slane %v1814_v13, %v2818_v17 }
 0x3ec   : > { %v1893_v52 = vsel %vm1660_vm0, %v1892_v21, %v1888_v25 }
 0x3ed   : > { %v1811_v32 = vpop.xlane.xlu0 %1810  ;;  %v1908_v36 = vsel %vm1735_vm10, %v1893_v52, %v1907_v34 }
 0x3ee   : > { %v1897_v3 = vrot.slane %v1811_v32, %v2815_v16 }
 0x3f0   : > { %v1902_v35 = vsel %vm1660_vm0, %v1901_v8, %v1897_v3 }
 0x3f1   : > { %v1909_v20 = vsel %vm1737_vm11, %v1902_v35, %v1908_v36 }
 0x3f2   : > { %v1911_v37 = vsel %vm752_vm7, %v1909_v20, 0.0 }
 0x3f3   : > { %1912 = vadd.xlane.f32.xlu1 %v1911_v37 }
 0x460   : > { %v1742_v38 = vpop.xlane.xlu0 %1741 }
 0x461   : > { %v1747_v17 = vrot.slane %v1742_v38, %v2815_v16 }
 0x463   : > { %1750 = vst.msk [vmem:[%s475_s15] sm:$0x1] %vm1749_vm12, %v1747_v17 }
 0x480   : > { %v1913_v39 = vpop.xlane.xlu1 %1912 }
 0x481   : > { %v1918_v45 = vrot.slane %v1913_v39, %v2815_v16 }
 0x483   : > { %1920 = vst.msk [vmem:[%s481_s18] sm:$0x1] %vm1749_vm12, %v1918_v45 }
 0x484 PF: > { %s17_s25 = sadd.s32 1, %s2335_s25   ;;  %s2917_s21 = smov %s2323_s22 }
 0x485   : > { %p14_p10 = scmp.ge.s32.totalorder %s17_s25, 4   ;;  %s2918_s22 = smov %s2450_s30 }
 0x486   : > { %s2919_s23 = smov %s2331_s24  ;;  %s2920_s24 = smov %s2922_s26 }
 0x487   :  { %16 = sbr.rel (!%p14_p10) target bundleno = 3 (0x3), region = 185 }

</bundles_post_ra>
